<compile_context>
chip_gen: v6e
topology: v6e:2x2x1
jax: 0.10.0
libtpu: 0.0.40
codegen_flags: <defaults>
</compile_context>

<pallas_src>
import functools

import numpy as np
import jax
import jax.numpy as jnp
from jax.experimental import pallas as pl
from jax.experimental.pallas import tpu as pltpu


# Hand-crafted ChaLearn2013 spatial path (J = 11 joints, 3 joints per path).
CHALEARN13_SPATIAL_PATH = np.array(
    [[1, 0, 1], [0, 1, 2], [1, 2, 1], [4, 3, 1], [5, 4, 3], [6, 5, 4],
     [5, 6, 5], [8, 7, 1], [9, 8, 7], [10, 9, 8], [9, 10, 9]], dtype=np.int32)

# signatory.Augment(include_original=True, include_time=True) channel order.
# TODO(synk): verify time-channel position against the exact signatory version
# when loading pretrained checkpoints; the math is permutation-equivalent.
TIME_FIRST = True


# ---------------------------------------------------------------------------
# Pallas kernel: depth-3 signature (basepoint=True) of a block of Bb paths,
# fused with the SigNet Linear projection.  Paths live on the lane axis.
# ---------------------------------------------------------------------------
def _signet_kernel(x_ref, rep_ref, tile_ref, w1_ref, w2_ref, w3k_ref, out_ref,
                   *, num_steps, c, c_out):
    """x_ref   : (L, c, Bb)      augmented stream values (time channel included)
       rep_ref : (c*c, c)        0/1 matrix, (rep_ref @ v)[i*c+j] = v[i]
       tile_ref: (c*c, c)        0/1 matrix, (tile_ref @ v)[i*c+j] = v[j]
       w1_ref  : (C_out, c)      level-1 weights (Linear bias folded into the
                                 time column, whose level-1 value is exactly 1)
       w2_ref  : (C_out, c*c)    level-2 weights, row-major (i, j)
       w3k_ref : (c*C_out, c*c)  level-3 weights regrouped by innermost index k:
                                 rows k*C_out:(k+1)*C_out hold W3[:, (i*c+j)*c+k]
       out_ref : (C_out, Bb)     projected signatures (lane-dense output block)
    """
    f32 = jnp.float32
    bb = x_ref.shape[-1]
    rep = rep_ref[...]
    tile = tile_ref[...]
    w3k = w3k_ref[...]

    def dot(a, b):
        return jnp.dot(a, b, preferred_element_type=f32)

    def add_level3(acc, m, d):
        # acc += W3 @ flat(m (x) d), computed as sum_k d[k] * (W3[.., k] @ m)
        # -- the (c^3, Bb) level-3 tensor is never materialised.
        g = dot(w3k, m)                                           # (c*C_out, Bb)
        for k in range(c):
            acc = acc + d[k:k + 1, :] * g[k * c_out:(k + 1) * c_out, :]
        return acc

    # ---- step 0: basepoint=True -> running signature starts at zero --------
    x_prev = x_ref[0]
    d = x_prev                                                    # first increment
    d_tile = dot(tile, d)                                         # tile2(d)
    dd = dot(rep, d) * d_tile                                     # flat d (x) d
    s1 = d                                                        # (c, Bb)
    s2 = 0.5 * dd                                                 # (c*c, Bb)
    out3 = add_level3(jnp.zeros((c_out, bb), f32), (1.0 / 6.0) * dd, d)

    # ---- steps 1 .. L-1: fused Chen updates on flat accumulators -----------
    #   s3-contribution uses m = s2_old + (s1_old/2 + d/6) (x) d
    #   s2 += (s1_old + d/2) (x) d ;  s1 += d
    for step in range(1, num_steps):                              # static, unrolled
        x_cur = x_ref[step]
        d = x_cur - x_prev
        d_tile = dot(tile, d)
        a_rep = dot(rep, s1 + 0.5 * d)                            # rep2(s1 + d/2)
        u_rep = dot(rep, 0.5 * s1 + (1.0 / 6.0) * d)              # rep2(s1/2 + d/6)
        out3 = add_level3(out3, s2 + u_rep * d_tile, d)
        s2 = s2 + a_rep * d_tile
        s1 = s1 + d
        x_prev = x_cur

    # ---- fused SigNet Linear (bias folded into w1's time column) -----------
    out_ref[...] = dot(w1_ref[...], s1) + dot(w2_ref[...], s2) + out3


def _selection_matrices(c):
    """Constant 0/1 matrices implementing flat rep/tile via the MXU."""
    m = np.arange(c * c)
    i = np.arange(c)
    rep = (m[:, None] // c == i[None, :]).astype(np.float32)      # (c*c, c)
    tile = (m[:, None] % c == i[None, :]).astype(np.float32)      # (c*c, c)
    return jnp.asarray(rep), jnp.asarray(tile)


def signet_pair_forward(streams, w1s, w2s, w3ks, *, block_b=256):
    """Merged spatial+temporal SigNet forward (single pallas_call).

    streams: (2, L, c, P)      augmented streams (time channel included),
                               path index on the last (lane) axis
    w1s    : (2, C_out, c)     level-1 weights with bias folded in
    w2s    : (2, C_out, c*c)   level-2 weights
    w3ks   : (2, c*C_out, c*c) regrouped level-3 weights
    returns (2, C_out, P) projected signatures.
    """
    nbranch, L, c, P = streams.shape
    c2 = c * c
    C_out = w1s.shape[1]
    assert block_b % 128 == 0
    nb = pl.cdiv(P, block_b)
    P_pad = nb * block_b
    streams = jnp.pad(streams.astype(jnp.float32),
                      ((0, 0), (0, 0), (0, 0), (0, P_pad - P)))
    rep, tile = _selection_matrices(c)

    kernel = functools.partial(_signet_kernel, num_steps=L, c=c, c_out=C_out)
    out = pl.pallas_call(
        kernel,
        out_shape=jax.ShapeDtypeStruct((nbranch, C_out, P_pad), jnp.float32),
        grid=(nbranch, nb),
        in_specs=[
            pl.BlockSpec((None, L, c, block_b), lambda g, i: (g, 0, 0, i)),
            pl.BlockSpec((c2, c), lambda g, i: (0, 0)),
            pl.BlockSpec((c2, c), lambda g, i: (0, 0)),
            pl.BlockSpec((None, C_out, c), lambda g, i: (g, 0, 0)),
            pl.BlockSpec((None, C_out, c2), lambda g, i: (g, 0, 0)),
            pl.BlockSpec((None, c * C_out, c2), lambda g, i: (g, 0, 0)),
        ],
        out_specs=pl.BlockSpec((None, C_out, block_b), lambda g, i: (g, 0, i)),
        compiler_params=pltpu.CompilerParams(
            dimension_semantics=("parallel", "parallel")),
    )(streams, rep, tile,
      w1s.astype(jnp.float32), w2s.astype(jnp.float32), w3ks.astype(jnp.float32))
    return out[:, :, :P]


# ---------------------------------------------------------------------------
# Wrapper-side stream / weight preparation.
# ---------------------------------------------------------------------------
def _build_branch_paths(x):
    """Gather the 3-step spatial and temporal paths.

    Returns (2, L=3, C, P) raw path values with P = J*B*T ordered
    (joint, batch, time) for branch 0 and (time, batch, joint) for branch 1,
    matching the PyTorch reference ordering.
    """
    B, C, J, T = x.shape
    L = 3
    P = J * B * T
    idx = jnp.asarray(CHALEARN13_SPATIAL_PATH)                    # (J, 3)
    xg = x[:, :, idx, :]                                          # (B, C, J, 3, T)
    sp = jnp.transpose(xg, (3, 1, 2, 0, 4)).reshape(L, C, P)      # p = j*B*T + b*T + t

    x_ps = jnp.pad(x, ((0, 0), (0, 0), (0, 0), (1, 1)), mode="edge")
    t_idx = jnp.arange(T)[:, None] + jnp.arange(3)[None, :]       # (T, 3)
    win = x_ps[:, :, :, t_idx]                                    # (B, C, J, T, 3)
    tp = jnp.transpose(win, (4, 1, 3, 0, 2)).reshape(L, C, P)     # p = t*B*J + b*J + j
    return jnp.stack([sp, tp], axis=0)                            # (2, L, C, P)


def _augment_time(paths):
    """signatory.Augment(include_original=True, include_time=True): add the
    time channel.  paths: (2, L, C, P) -> (2, L, C+1, P)."""
    nbranch, L, C, P = paths.shape
    tvals = jnp.linspace(0.0, 1.0, L, dtype=jnp.float32)
    tch = jnp.broadcast_to(tvals[None, :, None, None], (nbranch, L, 1, P))
    if TIME_FIRST:
        return jnp.concatenate([tch, paths.astype(jnp.float32)], axis=2)
    return jnp.concatenate([paths.astype(jnp.float32), tch], axis=2)


def _prep_signet_weights(weight, bias, c, c_out):
    """Split the (C_out, S) SigNet Linear weight into per-level pieces, fold
    the bias into the level-1 time column, and regroup level 3 by its
    innermost index k."""
    c2 = c * c
    time_col = 0 if TIME_FIRST else c - 1
    w1 = weight[:, :c].astype(jnp.float32)
    w1 = w1.at[:, time_col].add(bias.astype(jnp.float32))   # level-1 time term == 1
    w2 = weight[:, c:c + c2].astype(jnp.float32)
    w3 = weight[:, c + c2:].astype(jnp.float32)
    w3k = jnp.transpose(w3.reshape(c_out, c2, c), (2, 0, 1)).reshape(c * c_out, c2)
    return w1, w2, w3k


def _prep_branch_weights(params, c, c_out):
    sp = _prep_signet_weights(params["sp_w"], params["sp_b"], c, c_out)
    tp = _prep_signet_weights(params["tp_w"], params["tp_b"], c, c_out)
    return tuple(jnp.stack([sp[i], tp[i]], axis=0) for i in range(3))


# ---------------------------------------------------------------------------
# Plain-JAX glue for the conv / ReLU / BN parts of STEM.
# ---------------------------------------------------------------------------
def _conv2d(x, w, b, padding):
    y = jax.lax.conv_general_dilated(
        x, w, window_strides=(1, 1), padding=padding,
        dimension_numbers=("NCHW", "OIHW", "NCHW"))
    return y + b[None, :, None, None]


def _batchnorm2d(x, bn, eps=1e-5):
    gamma, beta, mean, var = bn
    inv = gamma / jnp.sqrt(var + eps)
    return (x - mean[None, :, None, None]) * inv[None, :, None, None] \
        + beta[None, :, None, None]


def stem_forward(x, params, *, block_b=256):
    """STEM.forward with spatial=True, temporal=True, conv=True, with_bn=True,
    bn_before_actfn=False (conv -> ReLU -> BN ordering)."""
    B, C, J, T = x.shape
    c = C + 1
    C_out = params["raw_w"].shape[0]
    x = x.astype(jnp.float32)

    # raw branch: Conv2d(C_in -> C_out, (1,3), pad (0,1)) -> ReLU -> BN
    x_conv = _batchnorm2d(
        jax.nn.relu(_conv2d(x, params["raw_w"], params["raw_b"],
                            ((0, 0), (1, 1)))),
        params["raw_bn"])

    # ---- merged spatial + temporal signature branches (one Pallas call) ----
    paths2 = _build_branch_paths(x)                               # (2, 3, C, P)
    streams = _augment_time(paths2)                               # (2, 3, c, P)
    w1s, w2s, w3ks = _prep_branch_weights(params, c, C_out)
    sig2 = signet_pair_forward(streams, w1s, w2s, w3ks, block_b=block_b)

    s_sig = jnp.transpose(sig2[0].reshape(C_out, J, B, T), (2, 0, 1, 3))
    t_sig = jnp.transpose(sig2[1].reshape(C_out, T, B, J), (2, 0, 3, 1))

    # ---- fusions ------------------------------------------------------------
    sig = jnp.concatenate([s_sig, t_sig], axis=1)                 # (B, 2*C_out, J, T)
    sig = _batchnorm2d(
        jax.nn.relu(_conv2d(sig, params["psf_w"], params["psf_b"],
                            ((0, 0), (0, 0)))),
        params["psf_bn"])
    x_out = jnp.concatenate([x_conv, sig], axis=1)                # (B, 2*C_out, J, T)
    x_out = _batchnorm2d(
        jax.nn.relu(_conv2d(x_out, params["f_w"], params["f_b"],
                            ((0, 0), (0, 0)))),
        params["f_bn"])
    return x_out                                                  # (B, C_out, J, T)


def init_stem_params(key, C_in, C_out):
    c = C_in + 1
    S = c + c * c + c * c * c
    ks = jax.random.split(key, 10)

    def bn_init(n):
        return (jnp.ones((n,), jnp.float32), jnp.zeros((n,), jnp.float32),
                jnp.zeros((n,), jnp.float32), jnp.ones((n,), jnp.float32))

    return {
        "raw_w": 0.1 * jax.random.normal(ks[0], (C_out, C_in, 1, 3), jnp.float32),
        "raw_b": 0.1 * jax.random.normal(ks[1], (C_out,), jnp.float32),
        "raw_bn": bn_init(C_out),
        "sp_w": 0.05 * jax.random.normal(ks[2], (C_out, S), jnp.float32),
        "sp_b": 0.05 * jax.random.normal(ks[3], (C_out,), jnp.float32),
        "tp_w": 0.05 * jax.random.normal(ks[4], (C_out, S), jnp.float32),
        "tp_b": 0.05 * jax.random.normal(ks[5], (C_out,), jnp.float32),
        "psf_w": 0.1 * jax.random.normal(ks[6], (C_out, 2 * C_out, 1, 1), jnp.float32),
        "psf_b": 0.1 * jax.random.normal(ks[7], (C_out,), jnp.float32),
        "psf_bn": bn_init(C_out),
        "f_w": 0.1 * jax.random.normal(ks[8], (C_out, 2 * C_out, 1, 1), jnp.float32),
        "f_b": 0.1 * jax.random.normal(ks[9], (C_out,), jnp.float32),
        "f_bn": bn_init(C_out),
    }


def _signet_reference(paths, weight, bias):
    """Pure-JAX SigNet (Augment -> depth-3 signature with basepoint -> Linear)
    for the correctness check.  paths: (P, 3, C) channels-last streams."""
    P, L, C = paths.shape
    c = C + 1
    tvals = jnp.linspace(0.0, 1.0, L, dtype=jnp.float32)
    tch = jnp.broadcast_to(tvals[None, :, None], (P, L, 1))
    if TIME_FIRST:
        streams = jnp.concatenate([tch, paths.astype(jnp.float32)], axis=-1)
    else:
        streams = jnp.concatenate([paths.astype(jnp.float32), tch], axis=-1)
    incs = jnp.concatenate(
        [streams[:, :1, :], streams[:, 1:, :] - streams[:, :-1, :]], axis=1)

    def one(path_incs):
        s1 = jnp.zeros((c,), jnp.float32)
        s2 = jnp.zeros((c, c), jnp.float32)
        s3 = jnp.zeros((c, c, c), jnp.float32)
        for k in range(L):
            d = path_incs[k]
            e2 = 0.5 * jnp.einsum("i,j->ij", d, d)
            e3 = (1.0 / 3.0) * jnp.einsum("i,jk->ijk", d, e2)
            s3 = (s3 + jnp.einsum("ij,k->ijk", s2, d)
                  + jnp.einsum("i,jk->ijk", s1, e2) + e3)
            s2 = s2 + jnp.einsum("i,j->ij", s1, d) + e2
            s1 = s1 + d
        return jnp.concatenate([s1, s2.reshape(-1), s3.reshape(-1)])

    sig = jax.vmap(one)(incs)                                       # (P, S)
    return jnp.dot(sig, weight.T.astype(jnp.float32),
                   precision=jax.lax.Precision.HIGHEST) + bias[None, :]


if __name__ == "__main__":
    # Small deterministic config.  J = 11 is fixed by the hand-crafted spatial
    # path table; B=2, C_in=4, T=8, C_out=16.
    B, C_in, J, T, C_out = 2, 4, 11, 8, 16
    key = jax.random.PRNGKey(0)
    kx, kp = jax.random.split(key)
    x = jax.random.normal(kx, (B, C_in, J, T), dtype=jnp.float32)
    params = init_stem_params(kp, C_in, C_out)

    fwd = jax.jit(functools.partial(stem_forward, block_b=256))
    out = jax.block_until_ready(fwd(x, params))
    assert out.shape == (B, C_out, J, T), out.shape
    assert out.dtype == jnp.float32

    # Correctness check: BOTH branches of the merged Pallas SigNet core vs a
    # pure-JAX reference.  Both sides are f32; 1e-4 is tight enough to catch
    # any layout / Chen-identity / weight-regroup bug (errors would be O(0.1+))
    # while tolerating MXU-vs-XLA f32 matmul rounding.
    c = C_in + 1
    paths2 = _build_branch_paths(x)                                  # (2, 3, C, P)
    streams = _augment_time(paths2)                                  # (2, 3, c, P)
    w1s, w2s, w3ks = _prep_branch_weights(params, c, C_out)
    got = jax.block_until_ready(
        signet_pair_forward(streams, w1s, w2s, w3ks, block_b=256))   # (2, C_out, P)
    branch_wb = [(params["sp_w"], params["sp_b"]),
                 (params["tp_w"], params["tp_b"])]
    for br, (w, b) in enumerate(branch_wb):
        ref = _signet_reference(jnp.transpose(paths2[br], (2, 0, 1)), w, b)
        np.testing.assert_allclose(np.asarray(got[br]).T, np.asarray(ref),
                                   rtol=1e-4, atol=1e-4)

    print("KERNEL_OK")
</pallas_src>

<mosaic_0001>
module attributes {stable_mosaic.version = 11 : i64} {
  func.func @_signet_kernel(%arg0: i32, %arg1: i32, %arg2: memref<1x3x5x256xf32, #tpu.memory_space<vmem>>, %arg3: memref<25x5xf32, #tpu.memory_space<vmem>>, %arg4: memref<25x5xf32, #tpu.memory_space<vmem>>, %arg5: memref<1x16x5xf32, #tpu.memory_space<vmem>>, %arg6: memref<1x16x25xf32, #tpu.memory_space<vmem>>, %arg7: memref<1x80x25xf32, #tpu.memory_space<vmem>>, %arg8: memref<1x16x256xf32, #tpu.memory_space<vmem>>) attributes {dimension_semantics = [#tpu.dimension_semantics<parallel>, #tpu.dimension_semantics<parallel>], iteration_bounds = array<i64: 2, 1>, scalar_prefetch = 0 : i64, scratch_operands = 0 : i64, tpu.core_type = #tpu.core_type<tc>, window_params = [{transform_indices = @transform_0, window_bounds = array<i64: 1, 3, 5, 256>}, {pipeline_mode = #tpu.pipeline_mode<synchronous>, transform_indices = @transform_1, window_bounds = array<i64: 25, 5>}, {pipeline_mode = #tpu.pipeline_mode<synchronous>, transform_indices = @transform_2, window_bounds = array<i64: 25, 5>}, {transform_indices = @transform_3, window_bounds = array<i64: 1, 16, 5>}, {transform_indices = @transform_4, window_bounds = array<i64: 1, 16, 25>}, {transform_indices = @transform_5, window_bounds = array<i64: 1, 80, 25>}, {transform_indices = @transform_6, window_bounds = array<i64: 1, 16, 256>}]} {
    %c0 = arith.constant 0 : index
    %c0_0 = arith.constant 0 : index
    %0 = vector.load %arg3[%c0, %c0_0] : memref<25x5xf32, #tpu.memory_space<vmem>>, vector<25x5xf32>
    %c0_1 = arith.constant 0 : index
    %c0_2 = arith.constant 0 : index
    %1 = vector.load %arg4[%c0_1, %c0_2] : memref<25x5xf32, #tpu.memory_space<vmem>>, vector<25x5xf32>
    %c0_3 = arith.constant 0 : index
    %c0_4 = arith.constant 0 : index
    %c0_5 = arith.constant 0 : index
    %2 = vector.load %arg7[%c0_3, %c0_4, %c0_5] : memref<1x80x25xf32, #tpu.memory_space<vmem>>, vector<1x80x25xf32>
    %3 = vector.shape_cast %2 : vector<1x80x25xf32> to vector<80x25xf32>
    %c0_6 = arith.constant 0 : index
    %c0_7 = arith.constant 0 : index
    %c0_8 = arith.constant 0 : index
    %c0_9 = arith.constant 0 : index
    %4 = vector.load %arg2[%c0_6, %c0_7, %c0_8, %c0_9] : memref<1x3x5x256xf32, #tpu.memory_space<vmem>>, vector<1x1x5x256xf32>
    %5 = vector.shape_cast %4 : vector<1x1x5x256xf32> to vector<5x256xf32>
    %cst = arith.constant dense<0.000000e+00> : vector<25x256xf32>
    %6 = tpu.matmul %1, %5, %cst {dimension_numbers = #tpu.dot_dimension_numbers<[1], [0], [0], [1], [0, 0, 1, 1], [], []>} : vector<25x5xf32>, vector<5x256xf32>, vector<25x256xf32> -> vector<25x256xf32>
    %cst_10 = arith.constant dense<0.000000e+00> : vector<25x256xf32>
    %7 = tpu.matmul %0, %5, %cst_10 {dimension_numbers = #tpu.dot_dimension_numbers<[1], [0], [0], [1], [0, 0, 1, 1], [], []>} : vector<25x5xf32>, vector<5x256xf32>, vector<25x256xf32> -> vector<25x256xf32>
    %8 = arith.mulf %7, %6 : vector<25x256xf32>
    %cst_11 = arith.constant 5.000000e-01 : f32
    %9 = vector.broadcast %cst_11 : f32 to vector<25x256xf32>
    %10 = arith.mulf %9, %8 : vector<25x256xf32>
    %cst_12 = arith.constant 0.000000e+00 : f32
    %11 = vector.broadcast %cst_12 : f32 to vector<16x256xf32>
    %cst_13 = arith.constant 0.166666672 : f32
    %12 = vector.broadcast %cst_13 : f32 to vector<25x256xf32>
    %13 = arith.mulf %12, %8 : vector<25x256xf32>
    %cst_14 = arith.constant dense<0.000000e+00> : vector<80x256xf32>
    %14 = tpu.matmul %3, %13, %cst_14 {dimension_numbers = #tpu.dot_dimension_numbers<[1], [0], [0], [1], [0, 0, 1, 1], [], []>} : vector<80x25xf32>, vector<25x256xf32>, vector<80x256xf32> -> vector<80x256xf32>
    %15 = vector.extract_strided_slice %5 {offsets = [0, 0], sizes = [1, 256], strides = [1, 1]} : vector<5x256xf32> to vector<1x256xf32>
    %16 = vector.extract_strided_slice %14 {offsets = [0, 0], sizes = [16, 256], strides = [1, 1]} : vector<80x256xf32> to vector<16x256xf32>
    %17 = vector.broadcast %15 : vector<1x256xf32> to vector<16x256xf32>
    %18 = arith.mulf %17, %16 : vector<16x256xf32>
    %19 = arith.addf %11, %18 : vector<16x256xf32>
    %20 = vector.extract_strided_slice %5 {offsets = [1, 0], sizes = [1, 256], strides = [1, 1]} : vector<5x256xf32> to vector<1x256xf32>
    %21 = vector.extract_strided_slice %14 {offsets = [16, 0], sizes = [16, 256], strides = [1, 1]} : vector<80x256xf32> to vector<16x256xf32>
    %22 = vector.broadcast %20 : vector<1x256xf32> to vector<16x256xf32>
    %23 = arith.mulf %22, %21 : vector<16x256xf32>
    %24 = arith.addf %19, %23 : vector<16x256xf32>
    %25 = vector.extract_strided_slice %5 {offsets = [2, 0], sizes = [1, 256], strides = [1, 1]} : vector<5x256xf32> to vector<1x256xf32>
    %26 = vector.extract_strided_slice %14 {offsets = [32, 0], sizes = [16, 256], strides = [1, 1]} : vector<80x256xf32> to vector<16x256xf32>
    %27 = vector.broadcast %25 : vector<1x256xf32> to vector<16x256xf32>
    %28 = arith.mulf %27, %26 : vector<16x256xf32>
    %29 = arith.addf %24, %28 : vector<16x256xf32>
    %30 = vector.extract_strided_slice %5 {offsets = [3, 0], sizes = [1, 256], strides = [1, 1]} : vector<5x256xf32> to vector<1x256xf32>
    %31 = vector.extract_strided_slice %14 {offsets = [48, 0], sizes = [16, 256], strides = [1, 1]} : vector<80x256xf32> to vector<16x256xf32>
    %32 = vector.broadcast %30 : vector<1x256xf32> to vector<16x256xf32>
    %33 = arith.mulf %32, %31 : vector<16x256xf32>
    %34 = arith.addf %29, %33 : vector<16x256xf32>
    %35 = vector.extract_strided_slice %5 {offsets = [4, 0], sizes = [1, 256], strides = [1, 1]} : vector<5x256xf32> to vector<1x256xf32>
    %36 = vector.extract_strided_slice %14 {offsets = [64, 0], sizes = [16, 256], strides = [1, 1]} : vector<80x256xf32> to vector<16x256xf32>
    %37 = vector.broadcast %35 : vector<1x256xf32> to vector<16x256xf32>
    %38 = arith.mulf %37, %36 : vector<16x256xf32>
    %39 = arith.addf %34, %38 : vector<16x256xf32>
    %c0_15 = arith.constant 0 : index
    %c1 = arith.constant 1 : index
    %c0_16 = arith.constant 0 : index
    %c0_17 = arith.constant 0 : index
    %40 = vector.load %arg2[%c0_15, %c1, %c0_16, %c0_17] : memref<1x3x5x256xf32, #tpu.memory_space<vmem>>, vector<1x1x5x256xf32>
    %41 = vector.shape_cast %40 : vector<1x1x5x256xf32> to vector<5x256xf32>
    %42 = arith.subf %41, %5 : vector<5x256xf32>
    %cst_18 = arith.constant dense<0.000000e+00> : vector<25x256xf32>
    %43 = tpu.matmul %1, %42, %cst_18 {dimension_numbers = #tpu.dot_dimension_numbers<[1], [0], [0], [1], [0, 0, 1, 1], [], []>} : vector<25x5xf32>, vector<5x256xf32>, vector<25x256xf32> -> vector<25x256xf32>
    %cst_19 = arith.constant 5.000000e-01 : f32
    %44 = vector.broadcast %cst_19 : f32 to vector<5x256xf32>
    %45 = arith.mulf %44, %42 : vector<5x256xf32>
    %46 = arith.addf %5, %45 : vector<5x256xf32>
    %cst_20 = arith.constant dense<0.000000e+00> : vector<25x256xf32>
    %47 = tpu.matmul %0, %46, %cst_20 {dimension_numbers = #tpu.dot_dimension_numbers<[1], [0], [0], [1], [0, 0, 1, 1], [], []>} : vector<25x5xf32>, vector<5x256xf32>, vector<25x256xf32> -> vector<25x256xf32>
    %cst_21 = arith.constant 5.000000e-01 : f32
    %48 = vector.broadcast %cst_21 : f32 to vector<5x256xf32>
    %49 = arith.mulf %48, %5 : vector<5x256xf32>
    %cst_22 = arith.constant 0.166666672 : f32
    %50 = vector.broadcast %cst_22 : f32 to vector<5x256xf32>
    %51 = arith.mulf %50, %42 : vector<5x256xf32>
    %52 = arith.addf %49, %51 : vector<5x256xf32>
    %cst_23 = arith.constant dense<0.000000e+00> : vector<25x256xf32>
    %53 = tpu.matmul %0, %52, %cst_23 {dimension_numbers = #tpu.dot_dimension_numbers<[1], [0], [0], [1], [0, 0, 1, 1], [], []>} : vector<25x5xf32>, vector<5x256xf32>, vector<25x256xf32> -> vector<25x256xf32>
    %54 = arith.mulf %53, %43 : vector<25x256xf32>
    %55 = arith.addf %10, %54 : vector<25x256xf32>
    %cst_24 = arith.constant dense<0.000000e+00> : vector<80x256xf32>
    %56 = tpu.matmul %3, %55, %cst_24 {dimension_numbers = #tpu.dot_dimension_numbers<[1], [0], [0], [1], [0, 0, 1, 1], [], []>} : vector<80x25xf32>, vector<25x256xf32>, vector<80x256xf32> -> vector<80x256xf32>
    %57 = vector.extract_strided_slice %42 {offsets = [0, 0], sizes = [1, 256], strides = [1, 1]} : vector<5x256xf32> to vector<1x256xf32>
    %58 = vector.extract_strided_slice %56 {offsets = [0, 0], sizes = [16, 256], strides = [1, 1]} : vector<80x256xf32> to vector<16x256xf32>
    %59 = vector.broadcast %57 : vector<1x256xf32> to vector<16x256xf32>
    %60 = arith.mulf %59, %58 : vector<16x256xf32>
    %61 = arith.addf %39, %60 : vector<16x256xf32>
    %62 = vector.extract_strided_slice %42 {offsets = [1, 0], sizes = [1, 256], strides = [1, 1]} : vector<5x256xf32> to vector<1x256xf32>
    %63 = vector.extract_strided_slice %56 {offsets = [16, 0], sizes = [16, 256], strides = [1, 1]} : vector<80x256xf32> to vector<16x256xf32>
    %64 = vector.broadcast %62 : vector<1x256xf32> to vector<16x256xf32>
    %65 = arith.mulf %64, %63 : vector<16x256xf32>
    %66 = arith.addf %61, %65 : vector<16x256xf32>
    %67 = vector.extract_strided_slice %42 {offsets = [2, 0], sizes = [1, 256], strides = [1, 1]} : vector<5x256xf32> to vector<1x256xf32>
    %68 = vector.extract_strided_slice %56 {offsets = [32, 0], sizes = [16, 256], strides = [1, 1]} : vector<80x256xf32> to vector<16x256xf32>
    %69 = vector.broadcast %67 : vector<1x256xf32> to vector<16x256xf32>
    %70 = arith.mulf %69, %68 : vector<16x256xf32>
    %71 = arith.addf %66, %70 : vector<16x256xf32>
    %72 = vector.extract_strided_slice %42 {offsets = [3, 0], sizes = [1, 256], strides = [1, 1]} : vector<5x256xf32> to vector<1x256xf32>
    %73 = vector.extract_strided_slice %56 {offsets = [48, 0], sizes = [16, 256], strides = [1, 1]} : vector<80x256xf32> to vector<16x256xf32>
    %74 = vector.broadcast %72 : vector<1x256xf32> to vector<16x256xf32>
    %75 = arith.mulf %74, %73 : vector<16x256xf32>
    %76 = arith.addf %71, %75 : vector<16x256xf32>
    %77 = vector.extract_strided_slice %42 {offsets = [4, 0], sizes = [1, 256], strides = [1, 1]} : vector<5x256xf32> to vector<1x256xf32>
    %78 = vector.extract_strided_slice %56 {offsets = [64, 0], sizes = [16, 256], strides = [1, 1]} : vector<80x256xf32> to vector<16x256xf32>
    %79 = vector.broadcast %77 : vector<1x256xf32> to vector<16x256xf32>
    %80 = arith.mulf %79, %78 : vector<16x256xf32>
    %81 = arith.addf %76, %80 : vector<16x256xf32>
    %82 = arith.mulf %47, %43 : vector<25x256xf32>
    %83 = arith.addf %10, %82 : vector<25x256xf32>
    %84 = arith.addf %5, %42 : vector<5x256xf32>
    %c0_25 = arith.constant 0 : index
    %c2 = arith.constant 2 : index
    %c0_26 = arith.constant 0 : index
    %c0_27 = arith.constant 0 : index
    %85 = vector.load %arg2[%c0_25, %c2, %c0_26, %c0_27] : memref<1x3x5x256xf32, #tpu.memory_space<vmem>>, vector<1x1x5x256xf32>
    %86 = vector.shape_cast %85 : vector<1x1x5x256xf32> to vector<5x256xf32>
    %87 = arith.subf %86, %41 : vector<5x256xf32>
    %cst_28 = arith.constant dense<0.000000e+00> : vector<25x256xf32>
    %88 = tpu.matmul %1, %87, %cst_28 {dimension_numbers = #tpu.dot_dimension_numbers<[1], [0], [0], [1], [0, 0, 1, 1], [], []>} : vector<25x5xf32>, vector<5x256xf32>, vector<25x256xf32> -> vector<25x256xf32>
    %cst_29 = arith.constant 5.000000e-01 : f32
    %89 = vector.broadcast %cst_29 : f32 to vector<5x256xf32>
    %90 = arith.mulf %89, %87 : vector<5x256xf32>
    %91 = arith.addf %84, %90 : vector<5x256xf32>
    %cst_30 = arith.constant dense<0.000000e+00> : vector<25x256xf32>
    %92 = tpu.matmul %0, %91, %cst_30 {dimension_numbers = #tpu.dot_dimension_numbers<[1], [0], [0], [1], [0, 0, 1, 1], [], []>} : vector<25x5xf32>, vector<5x256xf32>, vector<25x256xf32> -> vector<25x256xf32>
    %cst_31 = arith.constant 5.000000e-01 : f32
    %93 = vector.broadcast %cst_31 : f32 to vector<5x256xf32>
    %94 = arith.mulf %93, %84 : vector<5x256xf32>
    %cst_32 = arith.constant 0.166666672 : f32
    %95 = vector.broadcast %cst_32 : f32 to vector<5x256xf32>
    %96 = arith.mulf %95, %87 : vector<5x256xf32>
    %97 = arith.addf %94, %96 : vector<5x256xf32>
    %cst_33 = arith.constant dense<0.000000e+00> : vector<25x256xf32>
    %98 = tpu.matmul %0, %97, %cst_33 {dimension_numbers = #tpu.dot_dimension_numbers<[1], [0], [0], [1], [0, 0, 1, 1], [], []>} : vector<25x5xf32>, vector<5x256xf32>, vector<25x256xf32> -> vector<25x256xf32>
    %99 = arith.mulf %98, %88 : vector<25x256xf32>
    %100 = arith.addf %83, %99 : vector<25x256xf32>
    %cst_34 = arith.constant dense<0.000000e+00> : vector<80x256xf32>
    %101 = tpu.matmul %3, %100, %cst_34 {dimension_numbers = #tpu.dot_dimension_numbers<[1], [0], [0], [1], [0, 0, 1, 1], [], []>} : vector<80x25xf32>, vector<25x256xf32>, vector<80x256xf32> -> vector<80x256xf32>
    %102 = vector.extract_strided_slice %87 {offsets = [0, 0], sizes = [1, 256], strides = [1, 1]} : vector<5x256xf32> to vector<1x256xf32>
    %103 = vector.extract_strided_slice %101 {offsets = [0, 0], sizes = [16, 256], strides = [1, 1]} : vector<80x256xf32> to vector<16x256xf32>
    %104 = vector.broadcast %102 : vector<1x256xf32> to vector<16x256xf32>
    %105 = arith.mulf %104, %103 : vector<16x256xf32>
    %106 = arith.addf %81, %105 : vector<16x256xf32>
    %107 = vector.extract_strided_slice %87 {offsets = [1, 0], sizes = [1, 256], strides = [1, 1]} : vector<5x256xf32> to vector<1x256xf32>
    %108 = vector.extract_strided_slice %101 {offsets = [16, 0], sizes = [16, 256], strides = [1, 1]} : vector<80x256xf32> to vector<16x256xf32>
    %109 = vector.broadcast %107 : vector<1x256xf32> to vector<16x256xf32>
    %110 = arith.mulf %109, %108 : vector<16x256xf32>
    %111 = arith.addf %106, %110 : vector<16x256xf32>
    %112 = vector.extract_strided_slice %87 {offsets = [2, 0], sizes = [1, 256], strides = [1, 1]} : vector<5x256xf32> to vector<1x256xf32>
    %113 = vector.extract_strided_slice %101 {offsets = [32, 0], sizes = [16, 256], strides = [1, 1]} : vector<80x256xf32> to vector<16x256xf32>
    %114 = vector.broadcast %112 : vector<1x256xf32> to vector<16x256xf32>
    %115 = arith.mulf %114, %113 : vector<16x256xf32>
    %116 = arith.addf %111, %115 : vector<16x256xf32>
    %117 = vector.extract_strided_slice %87 {offsets = [3, 0], sizes = [1, 256], strides = [1, 1]} : vector<5x256xf32> to vector<1x256xf32>
    %118 = vector.extract_strided_slice %101 {offsets = [48, 0], sizes = [16, 256], strides = [1, 1]} : vector<80x256xf32> to vector<16x256xf32>
    %119 = vector.broadcast %117 : vector<1x256xf32> to vector<16x256xf32>
    %120 = arith.mulf %119, %118 : vector<16x256xf32>
    %121 = arith.addf %116, %120 : vector<16x256xf32>
    %122 = vector.extract_strided_slice %87 {offsets = [4, 0], sizes = [1, 256], strides = [1, 1]} : vector<5x256xf32> to vector<1x256xf32>
    %123 = vector.extract_strided_slice %101 {offsets = [64, 0], sizes = [16, 256], strides = [1, 1]} : vector<80x256xf32> to vector<16x256xf32>
    %124 = vector.broadcast %122 : vector<1x256xf32> to vector<16x256xf32>
    %125 = arith.mulf %124, %123 : vector<16x256xf32>
    %126 = arith.addf %121, %125 : vector<16x256xf32>
    %127 = arith.mulf %92, %88 : vector<25x256xf32>
    %128 = arith.addf %83, %127 : vector<25x256xf32>
    %129 = arith.addf %84, %87 : vector<5x256xf32>
    %c0_35 = arith.constant 0 : index
    %c0_36 = arith.constant 0 : index
    %c0_37 = arith.constant 0 : index
    %130 = vector.load %arg5[%c0_35, %c0_36, %c0_37] : memref<1x16x5xf32, #tpu.memory_space<vmem>>, vector<1x16x5xf32>
    %131 = vector.shape_cast %130 : vector<1x16x5xf32> to vector<16x5xf32>
    %cst_38 = arith.constant dense<0.000000e+00> : vector<16x256xf32>
    %132 = tpu.matmul %131, %129, %cst_38 {dimension_numbers = #tpu.dot_dimension_numbers<[1], [0], [0], [1], [0, 0, 1, 1], [], []>} : vector<16x5xf32>, vector<5x256xf32>, vector<16x256xf32> -> vector<16x256xf32>
    %c0_39 = arith.constant 0 : index
    %c0_40 = arith.constant 0 : index
    %c0_41 = arith.constant 0 : index
    %133 = vector.load %arg6[%c0_39, %c0_40, %c0_41] : memref<1x16x25xf32, #tpu.memory_space<vmem>>, vector<1x16x25xf32>
    %134 = vector.shape_cast %133 : vector<1x16x25xf32> to vector<16x25xf32>
    %cst_42 = arith.constant dense<0.000000e+00> : vector<16x256xf32>
    %135 = tpu.matmul %134, %128, %cst_42 {dimension_numbers = #tpu.dot_dimension_numbers<[1], [0], [0], [1], [0, 0, 1, 1], [], []>} : vector<16x25xf32>, vector<25x256xf32>, vector<16x256xf32> -> vector<16x256xf32>
    %136 = arith.addf %132, %135 : vector<16x256xf32>
    %137 = arith.addf %136, %126 : vector<16x256xf32>
    %c0_43 = arith.constant 0 : index
    %c0_44 = arith.constant 0 : index
    %c0_45 = arith.constant 0 : index
    %138 = vector.load %arg8[%c0_43, %c0_44, %c0_45] : memref<1x16x256xf32, #tpu.memory_space<vmem>>, vector<1x16x256xf32>
    %139 = vector.shape_cast %138 : vector<1x16x256xf32> to vector<16x256xf32>
    %140 = vector.shape_cast %137 : vector<16x256xf32> to vector<1x16x256xf32>
    tpu.vector_store %arg8[%c0_43, %c0_44, %c0_45], %140 {strides = array<i32>} : memref<1x16x256xf32, #tpu.memory_space<vmem>>, vector<1x16x256xf32>,
    return
  }
  func.func @transform_0(%arg0: i32, %arg1: i32) -> (i32, i32, i32, i32) {
    %c0_i32 = arith.constant 0 : i32
    %c0_i32_0 = arith.constant 0 : i32
    %c0_i32_1 = arith.constant 0 : i32
    return %arg0, %c0_i32, %c0_i32_0, %arg1 : i32, i32, i32, i32
  }
  func.func @transform_1(%arg0: i32, %arg1: i32) -> (i32, i32) {
    %c0_i32 = arith.constant 0 : i32
    %c0_i32_0 = arith.constant 0 : i32
    %c0_i32_1 = arith.constant 0 : i32
    return %c0_i32, %c0_i32_0 : i32, i32
  }
  func.func @transform_2(%arg0: i32, %arg1: i32) -> (i32, i32) {
    %c0_i32 = arith.constant 0 : i32
    %c0_i32_0 = arith.constant 0 : i32
    %c0_i32_1 = arith.constant 0 : i32
    return %c0_i32, %c0_i32_0 : i32, i32
  }
  func.func @transform_3(%arg0: i32, %arg1: i32) -> (i32, i32, i32) {
    %c0_i32 = arith.constant 0 : i32
    %c0_i32_0 = arith.constant 0 : i32
    %c0_i32_1 = arith.constant 0 : i32
    return %arg0, %c0_i32, %c0_i32_0 : i32, i32, i32
  }
  func.func @transform_4(%arg0: i32, %arg1: i32) -> (i32, i32, i32) {
    %c0_i32 = arith.constant 0 : i32
    %c0_i32_0 = arith.constant 0 : i32
    %c0_i32_1 = arith.constant 0 : i32
    return %arg0, %c0_i32, %c0_i32_0 : i32, i32, i32
  }
  func.func @transform_5(%arg0: i32, %arg1: i32) -> (i32, i32, i32) {
    %c0_i32 = arith.constant 0 : i32
    %c0_i32_0 = arith.constant 0 : i32
    %c0_i32_1 = arith.constant 0 : i32
    return %arg0, %c0_i32, %c0_i32_0 : i32, i32, i32
  }
  func.func @transform_6(%arg0: i32, %arg1: i32) -> (i32, i32, i32) {
    %c0_i32 = arith.constant 0 : i32
    %c0_i32_0 = arith.constant 0 : i32
    return %arg0, %c0_i32, %arg1 : i32, i32, i32
  }
}

</mosaic_0001>

<bundles_post_ra>
// kernel: squeeze.3
= control target key start
LH: loop header
LB: loop body
LE: loop exit
PB: predicated region body
PF: predicated region fallthrough
CT: control target
= control target key end

     0   :  { %vm683_vm0 = vcmask 990208   ;;  %vm67_vm1 = vcmask 89088   ;;  %s2147_s10 = smov 117   ;;  %s2148_s11 = smov 113   ;;  %vm687_vm2 = vcmask 56320   ;;  %vm704_vm3 = vcmask 89144   ;;  %s2968_s0 = inlined_call_operand.vmem [shape: bf16[1,16,176], index: 0, kind: input, shape index: {}]   ;;  %s2969_s1 = inlined_call_operand.vmem [shape: bf16[16,8,2,11], index: 1, kind: output, shape index: {}]  }
   0x1   :  { %v2054_v0 = vld [vmem:[%s2968_s0 + $0x8] sm:$0xff]   ;;  %v2051_v1 = vld [vmem:[%s2968_s0] sm:$0xff]   ;;  %s2146_s0 = smov 124   ;;  %s2149_s12 = smov 7   ;;  %v2161_v32 = vmov 0.0  }
   0x2   :  { %v2049_v2 = vunpack.c.h.bf16 %v2054_v0  ;;  %v2052_v3 = vunpack.c.l.bf16 %v2051_v1  ;;  %v2053_v4 = vunpack.c.h.bf16 %v2051_v1  ;;  %v2048_v5 = vunpack.c.l.bf16 %v2054_v0  ;;  %s2150_s13 = smov 102   ;;  %s2151_s14 = smov 106  }
   0x3   :  { %s2152_s15 = smov 91   ;;  %s2153_s16 = smov 95  }
   0x4   :  { %v2071_v6 = vpack.i.bf16 %v2049_v2, %v2053_v4  ;;  %v2076_v7 = vpack.i.bf16 %v2048_v5, %v2052_v3  ;;  %v684_v8 = vsel %vm683_vm0, %v2053_v4, %v2052_v3  ;;  %68 = vst.msk [vmem:[#allocation0] sm:$0x1] %vm67_vm1, %v2052_v3   ;;  %70 = vst.msk [vmem:[#allocation0 + $0x3f] sm:$0x2] %vm67_vm1, %v2052_v3   ;;  %s2154_s17 = smov 73   ;;  %s2155_s18 = smov 84  }
   0x5   :  { %72 = vst.msk [vmem:[#allocation0 + $0x7e] sm:$0x4] %vm67_vm1, %v2052_v3   ;;  %74 = vst.msk [vmem:[#allocation0 + $0xbd] sm:$0x8] %vm67_vm1, %v2052_v3   ;;  %v726_v9 = vsel %vm683_vm0, %v2049_v2, %v2048_v5  ;;  %s2156_s19 = smov 51   ;;  %s2157_s20 = smov 62  }
   0x6   :  { %76 = vst.msk [vmem:[#allocation0 + $0xfc] sm:$0x10] %vm67_vm1, %v2052_v3   ;;  %78 = vst.msk [vmem:[#allocation0 + $0x13b] sm:$0x20] %vm67_vm1, %v2052_v3   ;;  %2072 = vrot.lane.b32.xlu0 %v2071_v6, %s2146_s0  ;;  %2077 = vrot.lane.b32.xlu1 %v2076_v7, %s2147_s10  ;;  %v2086_v10 = vpack.i.bf16 %v726_v9, %v684_v8  ;;  %s2158_s21 = smov 29   ;;  %s2159_s22 = smov 40  }
   0x7   :  { %80 = vst.msk [vmem:[#allocation0 + $0x17a] sm:$0x40] %vm67_vm1, %v2052_v3   ;;  %82 = vst.msk [vmem:[#allocation0 + $0x1b9] sm:$0x80] %vm67_vm1, %v2052_v3   ;;  %s2160_s23 = smov 18  }
   0x8   :  { %87 = vst.msk [vmem:[#allocation0 + $0x200] sm:$0x1] %vm67_vm1, %v2048_v5   ;;  %89 = vst.msk [vmem:[#allocation0 + $0x23f] sm:$0x2] %vm67_vm1, %v2048_v5  }
   0x9   :  { %91 = vst.msk [vmem:[#allocation0 + $0x27e] sm:$0x4] %vm67_vm1, %v2048_v5   ;;  %93 = vst.msk [vmem:[#allocation0 + $0x2bd] sm:$0x8] %vm67_vm1, %v2048_v5  }
   0xa   :  { %95 = vst.msk [vmem:[#allocation0 + $0x2fc] sm:$0x10] %vm67_vm1, %v2048_v5   ;;  %97 = vst.msk [vmem:[#allocation0 + $0x33b] sm:$0x20] %vm67_vm1, %v2048_v5   ;;  %2082 = vrot.lane.b32.xlu1 %v2071_v6, %s2148_s11  ;;  %2087 = vrot.lane.b32.xlu0 %v2086_v10, %s2149_s12 }
   0xb   :  { %99 = vst.msk [vmem:[#allocation0 + $0x37a] sm:$0x40] %vm67_vm1, %v2048_v5   ;;  %101 = vst.msk [vmem:[#allocation0 + $0x3b9] sm:$0x80] %vm67_vm1, %v2048_v5  }
   0xe   :  { %2097 = vrot.lane.b32.xlu1 %v2071_v6, %s2150_s13  ;;  %2092 = vrot.lane.b32.xlu0 %v2076_v7, %s2151_s14 }
  0x12   :  { %2107 = vrot.lane.b32.xlu1 %v2071_v6, %s2152_s15  ;;  %2102 = vrot.lane.b32.xlu0 %v2076_v7, %s2153_s16 }
  0x16   :  { %2117 = vrot.lane.b32.xlu1 %v2076_v7, %s2154_s17  ;;  %2112 = vrot.lane.b32.xlu0 %v2076_v7, %s2155_s18 }
  0x1a   :  { %2127 = vrot.lane.b32.xlu1 %v2076_v7, %s2156_s19  ;;  %2122 = vrot.lane.b32.xlu0 %v2076_v7, %s2157_s20 }
  0x1e   :  { %2137 = vrot.lane.b32.xlu1 %v2076_v7, %s2158_s21  ;;  %2132 = vrot.lane.b32.xlu0 %v2076_v7, %s2159_s22 }
  0x22   :  { %2142 = vrot.lane.b32.xlu0 %v2076_v7, %s2160_s23 }
  0x78   :  { %v2073_v11 = vpop.permute.xlu0 %2072  ;;  %v2078_v12 = vpop.permute.xlu1 %2077 }
  0x79   :  { %v2075_v13 = vunpack.i.h.bf16 %v2073_v11  ;;  %v2074_v14 = vunpack.i.l.bf16 %v2073_v11  ;;  %v2080_v15 = vunpack.i.h.bf16 %v2078_v12  ;;  %v2079_v16 = vunpack.i.l.bf16 %v2078_v12 }
  0x7b   :  { %129 = vst.msk [vmem:[#allocation0 + $0x230] sm:$0x1] %vm67_vm1, %v2075_v13   ;;  %131 = vst.msk [vmem:[#allocation0 + $0x26f] sm:$0x2] %vm67_vm1, %v2075_v13  }
  0x7c   :  { %133 = vst.msk [vmem:[#allocation0 + $0x2ae] sm:$0x4] %vm67_vm1, %v2075_v13   ;;  %135 = vst.msk [vmem:[#allocation0 + $0x2ed] sm:$0x8] %vm67_vm1, %v2075_v13   ;;  %v2083_v17 = vpop.permute.xlu1 %2082  ;;  %v2088_v18 = vpop.permute.xlu0 %2087 }
  0x7d   :  { %137 = vst.msk [vmem:[#allocation0 + $0x32c] sm:$0x10] %vm67_vm1, %v2075_v13   ;;  %139 = vst.msk [vmem:[#allocation0 + $0x36b] sm:$0x20] %vm67_vm1, %v2075_v13   ;;  %v2085_v19 = vunpack.i.h.bf16 %v2083_v17  ;;  %v2084_v20 = vunpack.i.l.bf16 %v2083_v17  ;;  %v2090_v21 = vunpack.i.h.bf16 %v2088_v18  ;;  %v2089_v22 = vunpack.i.l.bf16 %v2088_v18 }
  0x7e   :  { %141 = vst.msk [vmem:[#allocation0 + $0x3aa] sm:$0x40] %vm67_vm1, %v2075_v13   ;;  %143 = vst.msk [vmem:[#allocation0 + $0x3e9] sm:$0x80] %vm67_vm1, %v2075_v13  }
  0x7f   :  { %108 = vst.msk [vmem:[#allocation0 + $0x30] sm:$0x1] %vm67_vm1, %v2074_v14   ;;  %110 = vst.msk [vmem:[#allocation0 + $0x6f] sm:$0x2] %vm67_vm1, %v2074_v14  }
  0x80   :  { %112 = vst.msk [vmem:[#allocation0 + $0xae] sm:$0x4] %vm67_vm1, %v2074_v14   ;;  %114 = vst.msk [vmem:[#allocation0 + $0xed] sm:$0x8] %vm67_vm1, %v2074_v14   ;;  %v2098_v23 = vpop.permute.xlu1 %2097  ;;  %v2093_v24 = vpop.permute.xlu0 %2092 }
  0x81   :  { %116 = vst.msk [vmem:[#allocation0 + $0x12c] sm:$0x10] %vm67_vm1, %v2074_v14   ;;  %118 = vst.msk [vmem:[#allocation0 + $0x16b] sm:$0x20] %vm67_vm1, %v2074_v14   ;;  %v2100_v25 = vunpack.i.h.bf16 %v2098_v23  ;;  %v2099_v26 = vunpack.i.l.bf16 %v2098_v23  ;;  %v2095_v27 = vunpack.i.h.bf16 %v2093_v24  ;;  %v2094_v28 = vunpack.i.l.bf16 %v2093_v24 }
  0x82   :  { %120 = vst.msk [vmem:[#allocation0 + $0x1aa] sm:$0x40] %vm67_vm1, %v2074_v14   ;;  %122 = vst.msk [vmem:[#allocation0 + $0x1e9] sm:$0x80] %vm67_vm1, %v2074_v14  }
  0x83   :  { %170 = vst.msk [vmem:[#allocation0 + $0x201] sm:$0x1] %vm67_vm1, %v2080_v15   ;;  %172 = vst.msk [vmem:[#allocation0 + $0x240] sm:$0x2] %vm67_vm1, %v2080_v15  }
  0x84   :  { %174 = vst.msk [vmem:[#allocation0 + $0x27f] sm:$0x4] %vm67_vm1, %v2080_v15   ;;  %176 = vst.msk [vmem:[#allocation0 + $0x2be] sm:$0x8] %vm67_vm1, %v2080_v15   ;;  %v2108_v45 = vpop.permute.xlu1 %2107  ;;  %v2103_v46 = vpop.permute.xlu0 %2102 }
  0x85   :  { %178 = vst.msk [vmem:[#allocation0 + $0x2fd] sm:$0x10] %vm67_vm1, %v2080_v15   ;;  %180 = vst.msk [vmem:[#allocation0 + $0x33c] sm:$0x20] %vm67_vm1, %v2080_v15   ;;  %v2110_v53 = vunpack.i.h.bf16 %v2108_v45  ;;  %v2109_v60 = vunpack.i.l.bf16 %v2108_v45  ;;  %v2105_v3 = vunpack.i.h.bf16 %v2103_v46  ;;  %v2104_v10 = vunpack.i.l.bf16 %v2103_v46 }
  0x86   :  { %182 = vst.msk [vmem:[#allocation0 + $0x37b] sm:$0x40] %vm67_vm1, %v2080_v15   ;;  %184 = vst.msk [vmem:[#allocation0 + $0x3ba] sm:$0x80] %vm67_vm1, %v2080_v15  }
  0x87   :  { %149 = vst.msk [vmem:[#allocation0 + $0x1] sm:$0x1] %vm67_vm1, %v2079_v16   ;;  %151 = vst.msk [vmem:[#allocation0 + $0x40] sm:$0x2] %vm67_vm1, %v2079_v16  }
  0x88   :  { %153 = vst.msk [vmem:[#allocation0 + $0x7f] sm:$0x4] %vm67_vm1, %v2079_v16   ;;  %155 = vst.msk [vmem:[#allocation0 + $0xbe] sm:$0x8] %vm67_vm1, %v2079_v16   ;;  %v2118_v11 = vpop.permute.xlu1 %2117  ;;  %v2378_v12 = vpop.permute.xlu0 %2112 }
  0x89   :  { %157 = vst.msk [vmem:[#allocation0 + $0xfd] sm:$0x10] %vm67_vm1, %v2079_v16   ;;  %159 = vst.msk [vmem:[#allocation0 + $0x13c] sm:$0x20] %vm67_vm1, %v2079_v16  }
  0x8a   :  { %161 = vst.msk [vmem:[#allocation0 + $0x17b] sm:$0x40] %vm67_vm1, %v2079_v16   ;;  %163 = vst.msk [vmem:[#allocation0 + $0x1ba] sm:$0x80] %vm67_vm1, %v2079_v16   ;;  %v1277_v44 = vld [vmem:[#allocation0 + $0x200] sm:$0x3] }
  0x8b   :  { %212 = vst.msk [vmem:[#allocation0 + $0x231] sm:$0x1] %vm67_vm1, %v2085_v19   ;;  %214 = vst.msk [vmem:[#allocation0 + $0x270] sm:$0x2] %vm67_vm1, %v2085_v19   ;;  %v1278_v49 = vpack.c.bf16 %v2161_v32, %v1277_v44  ;;  %v1341_v50 = vld [vmem:[#allocation0 + $0x240] sm:$0x3] }
  0x8c   :  { %216 = vst.msk [vmem:[#allocation0 + $0x2af] sm:$0x4] %vm67_vm1, %v2085_v19   ;;  %218 = vst.msk [vmem:[#allocation0 + $0x2ee] sm:$0x8] %vm67_vm1, %v2085_v19   ;;  %v1405_v51 = vld [vmem:[#allocation0 + $0x280] sm:$0x3]  ;;  %v1342_v54 = vpack.c.bf16 %v2161_v32, %v1341_v50 }
  0x8d   :  { %220 = vst.msk [vmem:[#allocation0 + $0x32d] sm:$0x10] %vm67_vm1, %v2085_v19   ;;  %222 = vst.msk [vmem:[#allocation0 + $0x36c] sm:$0x20] %vm67_vm1, %v2085_v19   ;;  %v1469_v52 = vld [vmem:[#allocation0 + $0x2c0] sm:$0x3]  ;;  %v1406_v55 = vpack.c.bf16 %v2161_v32, %v1405_v51 }
  0x8e   :  { %224 = vst.msk [vmem:[#allocation0 + $0x3ab] sm:$0x40] %vm67_vm1, %v2085_v19   ;;  %226 = vst.msk [vmem:[#allocation0 + $0x3ea] sm:$0x80] %vm67_vm1, %v2085_v19   ;;  %v768_v29 = vld [vmem:[#allocation0] sm:$0x3]  ;;  %v1470_v56 = vpack.c.bf16 %v2161_v32, %v1469_v52  ;;  %v2120_v19 = vunpack.i.h.bf16 %v2118_v11 }
  0x8f   :  { %191 = vst.msk [vmem:[#allocation0 + $0x31] sm:$0x1] %vm67_vm1, %v2084_v20   ;;  %193 = vst.msk [vmem:[#allocation0 + $0x70] sm:$0x2] %vm67_vm1, %v2084_v20   ;;  %v829_v30 = vld [vmem:[#allocation0 + $0x40] sm:$0x3]  ;;  %v769_v33 = vpack.c.bf16 %v2161_v32, %v768_v29 }
  0x90   :  { %195 = vst.msk [vmem:[#allocation0 + $0xaf] sm:$0x4] %vm67_vm1, %v2084_v20   ;;  %197 = vst.msk [vmem:[#allocation0 + $0xee] sm:$0x8] %vm67_vm1, %v2084_v20   ;;  %v893_v31 = vld [vmem:[#allocation0 + $0x80] sm:$0x3]  ;;  %v830_v34 = vpack.c.bf16 %v2161_v32, %v829_v30 }
  0x91   :  { %199 = vst.msk [vmem:[#allocation0 + $0x12d] sm:$0x10] %vm67_vm1, %v2084_v20   ;;  %201 = vst.msk [vmem:[#allocation0 + $0x16c] sm:$0x20] %vm67_vm1, %v2084_v20   ;;  %v894_v35 = vpack.c.bf16 %v2161_v32, %v893_v31  ;;  %v957_v36 = vld [vmem:[#allocation0 + $0xc0] sm:$0x3] }
  0x92   :  { %203 = vst.msk [vmem:[#allocation0 + $0x1ab] sm:$0x40] %vm67_vm1, %v2084_v20   ;;  %205 = vst.msk [vmem:[#allocation0 + $0x1ea] sm:$0x80] %vm67_vm1, %v2084_v20   ;;  %v1021_v37 = vld [vmem:[#allocation0 + $0x100] sm:$0x3]  ;;  %v958_v39 = vpack.c.bf16 %v2161_v32, %v957_v36 }
  0x93   :  { %689 = vst.msk [vmem:[#allocation0 + $0x29] sm:$0x1] %vm687_vm2, %v2089_v22   ;;  %691 = vst.msk [vmem:[#allocation0 + $0x68] sm:$0x2] %vm687_vm2, %v2089_v22   ;;  %v1085_v38 = vld [vmem:[#allocation0 + $0x140] sm:$0x3]  ;;  %v1022_v40 = vpack.c.bf16 %v2161_v32, %v1021_v37 }
  0x94   :  { %693 = vst.msk [vmem:[#allocation0 + $0xa7] sm:$0x4] %vm687_vm2, %v2089_v22   ;;  %695 = vst.msk [vmem:[#allocation0 + $0xe6] sm:$0x8] %vm687_vm2, %v2089_v22   ;;  %v1086_v41 = vpack.c.bf16 %v2161_v32, %v1085_v38  ;;  %v1149_v42 = vld [vmem:[#allocation0 + $0x180] sm:$0x3] }
  0x95   :  { %697 = vst.msk [vmem:[#allocation0 + $0x125] sm:$0x10] %vm687_vm2, %v2089_v22   ;;  %699 = vst.msk [vmem:[#allocation0 + $0x164] sm:$0x20] %vm687_vm2, %v2089_v22   ;;  %v1213_v43 = vld [vmem:[#allocation0 + $0x1c0] sm:$0x3]  ;;  %v1150_v47 = vpack.c.bf16 %v2161_v32, %v1149_v42  ;;  %v2123_v42 = vpop.permute.xlu0 %2122 }
  0x96   :  { %701 = vst.msk [vmem:[#allocation0 + $0x1a3] sm:$0x40] %vm687_vm2, %v2089_v22   ;;  %703 = vst.msk [vmem:[#allocation0 + $0x1e2] sm:$0x80] %vm687_vm2, %v2089_v22   ;;  %v1214_v48 = vpack.c.bf16 %v2161_v32, %v1213_v43  ;;  %v1533_v57 = vld [vmem:[#allocation0 + $0x300] sm:$0x3]  ;;  %v2125_v50 = vunpack.i.h.bf16 %v2123_v42  ;;  %v2124_v51 = vunpack.i.l.bf16 %v2123_v42 }
  0x97   :  { %731 = vst.msk [vmem:[#allocation0 + $0x229] sm:$0x1] %vm687_vm2, %v2090_v21   ;;  %733 = vst.msk [vmem:[#allocation0 + $0x268] sm:$0x2] %vm687_vm2, %v2090_v21   ;;  %v1597_v58 = vld [vmem:[#allocation0 + $0x340] sm:$0x3]  ;;  %v1534_v61 = vpack.c.bf16 %v2161_v32, %v1533_v57 }
  0x98   :  { %735 = vst.msk [vmem:[#allocation0 + $0x2a7] sm:$0x4] %vm687_vm2, %v2090_v21   ;;  %737 = vst.msk [vmem:[#allocation0 + $0x2e6] sm:$0x8] %vm687_vm2, %v2090_v21   ;;  %v1661_v59 = vld [vmem:[#allocation0 + $0x380] sm:$0x3]  ;;  %v1598_v62 = vpack.c.bf16 %v2161_v32, %v1597_v58 }
  0x99   :  { %739 = vst.msk [vmem:[#allocation0 + $0x325] sm:$0x10] %vm687_vm2, %v2090_v21   ;;  %741 = vst.msk [vmem:[#allocation0 + $0x364] sm:$0x20] %vm687_vm2, %v2090_v21   ;;  %v1662_v63 = vpack.c.bf16 %v2161_v32, %v1661_v59  ;;  %v1725_v0 = vld [vmem:[#allocation0 + $0x3c0] sm:$0x3] }
  0x9a   :  { %743 = vst.msk [vmem:[#allocation0 + $0x3a3] sm:$0x40] %vm687_vm2, %v2090_v21   ;;  %745 = vst.msk [vmem:[#allocation0 + $0x3e2] sm:$0x80] %vm687_vm2, %v2090_v21   ;;  %v1325_v1 = vld [vmem:[#allocation0 + $0x230] sm:$0x3]  ;;  %v1726_v4 = vpack.c.bf16 %v2161_v32, %v1725_v0 }
  0x9b   :  { %706 = vst.msk [vmem:[#allocation0 + $0x29] sm:$0x1] %vm704_vm3, %v2089_v22   ;;  %708 = vst.msk [vmem:[#allocation0 + $0x68] sm:$0x2] %vm704_vm3, %v2089_v22   ;;  %v1389_v2 = vld [vmem:[#allocation0 + $0x270] sm:$0x3]  ;;  %v1326_v5 = vpack.c.bf16 %v2161_v32, %v1325_v1  ;;  %v2133_v1 = vpop.permute.xlu0 %2132 }
  0x9c   :  { %710 = vst.msk [vmem:[#allocation0 + $0xa7] sm:$0x4] %vm704_vm3, %v2089_v22   ;;  %712 = vst.msk [vmem:[#allocation0 + $0xe6] sm:$0x8] %vm704_vm3, %v2089_v22   ;;  %v1390_v6 = vpack.c.bf16 %v2161_v32, %v1389_v2  ;;  %v1453_v7 = vld [vmem:[#allocation0 + $0x2b0] sm:$0x3] }
  0x9d   :  { %714 = vst.msk [vmem:[#allocation0 + $0x125] sm:$0x10] %vm704_vm3, %v2089_v22   ;;  %716 = vst.msk [vmem:[#allocation0 + $0x164] sm:$0x20] %vm704_vm3, %v2089_v22   ;;  %v1517_v8 = vld [vmem:[#allocation0 + $0x2f0] sm:$0x3]  ;;  %v1454_v13 = vpack.c.bf16 %v2161_v32, %v1453_v7 }
  0x9e   :  { %718 = vst.msk [vmem:[#allocation0 + $0x1a3] sm:$0x40] %vm704_vm3, %v2089_v22   ;;  %720 = vst.msk [vmem:[#allocation0 + $0x1e2] sm:$0x80] %vm704_vm3, %v2089_v22   ;;  %v1581_v9 = vld [vmem:[#allocation0 + $0x330] sm:$0x3]  ;;  %v1518_v14 = vpack.c.bf16 %v2161_v32, %v1517_v8 }
  0x9f   :  { %748 = vst.msk [vmem:[#allocation0 + $0x229] sm:$0x1] %vm704_vm3, %v2090_v21   ;;  %750 = vst.msk [vmem:[#allocation0 + $0x268] sm:$0x2] %vm704_vm3, %v2090_v21   ;;  %v1582_v15 = vpack.c.bf16 %v2161_v32, %v1581_v9  ;;  %v1645_v16 = vld [vmem:[#allocation0 + $0x370] sm:$0x3] }
  0xa0   :  { %752 = vst.msk [vmem:[#allocation0 + $0x2a7] sm:$0x4] %vm704_vm3, %v2090_v21   ;;  %754 = vst.msk [vmem:[#allocation0 + $0x2e6] sm:$0x8] %vm704_vm3, %v2090_v21   ;;  %v941_v17 = vld [vmem:[#allocation0 + $0xb0] sm:$0x3]  ;;  %v1646_v20 = vpack.c.bf16 %v2161_v32, %v1645_v16 }
  0xa1   :  { %756 = vst.msk [vmem:[#allocation0 + $0x325] sm:$0x10] %vm704_vm3, %v2090_v21   ;;  %758 = vst.msk [vmem:[#allocation0 + $0x364] sm:$0x20] %vm704_vm3, %v2090_v21   ;;  %v1005_v18 = vld [vmem:[#allocation0 + $0xf0] sm:$0x3] }
  0xa2   :  { %760 = vst.msk [vmem:[#allocation0 + $0x3a3] sm:$0x40] %vm704_vm3, %v2090_v21   ;;  %762 = vst.msk [vmem:[#allocation0 + $0x3e2] sm:$0x80] %vm704_vm3, %v2090_v21   ;;  %v942_v21 = vpack.c.bf16 %v2161_v32, %v941_v17  ;;  %v1006_v22 = vpack.c.bf16 %v2161_v32, %v1005_v18  ;;  %v1069_v23 = vld [vmem:[#allocation0 + $0x130] sm:$0x3] }
  0xa3   :  { %295 = vst.msk [vmem:[#allocation0 + $0x238] sm:$0x1] %vm67_vm1, %v2100_v25   ;;  %297 = vst.msk [vmem:[#allocation0 + $0x277] sm:$0x2] %vm67_vm1, %v2100_v25   ;;  %v1133_v24 = vld [vmem:[#allocation0 + $0x170] sm:$0x3] }
  0xa4   :  { %299 = vst.msk [vmem:[#allocation0 + $0x2b6] sm:$0x4] %vm67_vm1, %v2100_v25   ;;  %301 = vst.msk [vmem:[#allocation0 + $0x2f5] sm:$0x8] %vm67_vm1, %v2100_v25   ;;  %v813_v30 = vld [vmem:[#allocation0 + $0x30] sm:$0x3] }
  0xa5   :  { %303 = vst.msk [vmem:[#allocation0 + $0x334] sm:$0x10] %vm67_vm1, %v2100_v25   ;;  %305 = vst.msk [vmem:[#allocation0 + $0x373] sm:$0x20] %vm67_vm1, %v2100_v25   ;;  %v877_v31 = vld [vmem:[#allocation0 + $0x70] sm:$0x3]  ;;  %v814_v37 = vpack.c.bf16 %v2161_v32, %v813_v30  ;;  %v2143_v30 = vpop.permute.xlu0 %2142 }
  0xa6   :  { %307 = vst.msk [vmem:[#allocation0 + $0x3b2] sm:$0x40] %vm67_vm1, %v2100_v25   ;;  %309 = vst.msk [vmem:[#allocation0 + $0x3f1] sm:$0x80] %vm67_vm1, %v2100_v25   ;;  %v1197_v25 = vld [vmem:[#allocation0 + $0x1b0] sm:$0x3]  ;;  %v878_v38 = vpack.c.bf16 %v2161_v32, %v877_v31 }
  0xa7   :  { %274 = vst.msk [vmem:[#allocation0 + $0x38] sm:$0x1] %vm67_vm1, %v2099_v26   ;;  %276 = vst.msk [vmem:[#allocation0 + $0x77] sm:$0x2] %vm67_vm1, %v2099_v26   ;;  %v1198_v29 = vpack.c.bf16 %v2161_v32, %v1197_v25  ;;  %v1773_v36 = vld [vmem:[#allocation0 + $0x3f0] sm:$0x3] }
  0xa8   :  { %278 = vst.msk [vmem:[#allocation0 + $0xb6] sm:$0x4] %vm67_vm1, %v2099_v26   ;;  %280 = vst.msk [vmem:[#allocation0 + $0xf5] sm:$0x8] %vm67_vm1, %v2099_v26   ;;  %v1774_v44 = vpack.c.bf16 %v2161_v32, %v1773_v36 }
  0xa9   :  { %282 = vst.msk [vmem:[#allocation0 + $0x134] sm:$0x10] %vm67_vm1, %v2099_v26   ;;  %284 = vst.msk [vmem:[#allocation0 + $0x173] sm:$0x20] %vm67_vm1, %v2099_v26  }
  0xaa   :  { %286 = vst.msk [vmem:[#allocation0 + $0x1b2] sm:$0x40] %vm67_vm1, %v2099_v26   ;;  %288 = vst.msk [vmem:[#allocation0 + $0x1f1] sm:$0x80] %vm67_vm1, %v2099_v26   ;;  %v2119_v26 = vunpack.i.l.bf16 %v2118_v11 }
  0xab   :  { %253 = vst.msk [vmem:[#allocation0 + $0x208] sm:$0x1] %vm67_vm1, %v2095_v27   ;;  %255 = vst.msk [vmem:[#allocation0 + $0x247] sm:$0x2] %vm67_vm1, %v2095_v27  }
  0xac   :  { %257 = vst.msk [vmem:[#allocation0 + $0x286] sm:$0x4] %vm67_vm1, %v2095_v27   ;;  %259 = vst.msk [vmem:[#allocation0 + $0x2c5] sm:$0x8] %vm67_vm1, %v2095_v27  }
  0xad   :  { %261 = vst.msk [vmem:[#allocation0 + $0x304] sm:$0x10] %vm67_vm1, %v2095_v27   ;;  %263 = vst.msk [vmem:[#allocation0 + $0x343] sm:$0x20] %vm67_vm1, %v2095_v27  }
  0xae   :  { %265 = vst.msk [vmem:[#allocation0 + $0x382] sm:$0x40] %vm67_vm1, %v2095_v27   ;;  %267 = vst.msk [vmem:[#allocation0 + $0x3c1] sm:$0x80] %vm67_vm1, %v2095_v27   ;;  %v1070_v27 = vpack.c.bf16 %v2161_v32, %v1069_v23 }
  0xaf   :  { %232 = vst.msk [vmem:[#allocation0 + $0x8] sm:$0x1] %vm67_vm1, %v2094_v28   ;;  %234 = vst.msk [vmem:[#allocation0 + $0x47] sm:$0x2] %vm67_vm1, %v2094_v28  }
  0xb0   :  { %236 = vst.msk [vmem:[#allocation0 + $0x86] sm:$0x4] %vm67_vm1, %v2094_v28   ;;  %238 = vst.msk [vmem:[#allocation0 + $0xc5] sm:$0x8] %vm67_vm1, %v2094_v28  }
  0xb1   :  { %240 = vst.msk [vmem:[#allocation0 + $0x104] sm:$0x10] %vm67_vm1, %v2094_v28   ;;  %242 = vst.msk [vmem:[#allocation0 + $0x143] sm:$0x20] %vm67_vm1, %v2094_v28  }
  0xb2   :  { %244 = vst.msk [vmem:[#allocation0 + $0x182] sm:$0x40] %vm67_vm1, %v2094_v28   ;;  %246 = vst.msk [vmem:[#allocation0 + $0x1c1] sm:$0x80] %vm67_vm1, %v2094_v28   ;;  %v1134_v28 = vpack.c.bf16 %v2161_v32, %v1133_v24 }
  0xb3   :  { %772 = vst [vmem:[%s2969_s1] sm:$0x1] %v769_v33  ;;  %1926 = vst [vmem:[%s2969_s1 + $0x8] sm:$0x1] %v830_v34  ;;  %v1261_v33 = vld [vmem:[#allocation0 + $0x1f0] sm:$0x3]  ;;  %v2115_v34 = vunpack.i.h.bf16 %v2378_v12 }
  0xb4   :  { %1934 = vst [vmem:[%s2969_s1 + $0x10] sm:$0x1] %v894_v35  ;;  %1942 = vst [vmem:[%s2969_s1 + $0x18] sm:$0x1] %v958_v39  ;;  %v1709_v35 = vld [vmem:[#allocation0 + $0x3b0] sm:$0x3]  ;;  %v1262_v39 = vpack.c.bf16 %v2161_v32, %v1261_v33 }
  0xb5   :  { %1950 = vst [vmem:[%s2969_s1 + $0x20] sm:$0x1] %v1022_v40  ;;  %1958 = vst [vmem:[%s2969_s1 + $0x28] sm:$0x1] %v1086_v41  ;;  %v2114_v40 = vunpack.i.l.bf16 %v2378_v12  ;;  %v2128_v41 = vpop.permute.xlu1 %2127  ;;  %v1710_v43 = vpack.c.bf16 %v2161_v32, %v1709_v35 }
  0xb6   :  { %1966 = vst [vmem:[%s2969_s1 + $0x30] sm:$0x1] %v1150_v47  ;;  %1974 = vst [vmem:[%s2969_s1 + $0x38] sm:$0x1] %v1214_v48  ;;  %v2130_v45 = vunpack.i.h.bf16 %v2128_v41  ;;  %v2129_v46 = vunpack.i.l.bf16 %v2128_v41 }
  0xb7   :  { %1982 = vst [vmem:[%s2969_s1 + $0x40] sm:$0x1] %v1278_v49  ;;  %378 = vst.msk [vmem:[#allocation0 + $0x239] sm:$0x1] %vm67_vm1, %v2110_v53  }
  0xb8   :  { %380 = vst.msk [vmem:[#allocation0 + $0x278] sm:$0x2] %vm67_vm1, %v2110_v53   ;;  %382 = vst.msk [vmem:[#allocation0 + $0x2b7] sm:$0x4] %vm67_vm1, %v2110_v53  }
  0xb9   :  { %384 = vst.msk [vmem:[#allocation0 + $0x2f6] sm:$0x8] %vm67_vm1, %v2110_v53   ;;  %386 = vst.msk [vmem:[#allocation0 + $0x335] sm:$0x10] %vm67_vm1, %v2110_v53   ;;  %v2138_v0 = vpop.permute.xlu1 %2137 }
  0xba   :  { %388 = vst.msk [vmem:[#allocation0 + $0x374] sm:$0x20] %vm67_vm1, %v2110_v53   ;;  %390 = vst.msk [vmem:[#allocation0 + $0x3b3] sm:$0x40] %vm67_vm1, %v2110_v53   ;;  %v2140_v8 = vunpack.i.h.bf16 %v2138_v0 }
  0xbb   :  { %392 = vst.msk [vmem:[#allocation0 + $0x3f2] sm:$0x80] %vm67_vm1, %v2110_v53   ;;  %1990 = vst [vmem:[%s2969_s1 + $0x48] sm:$0x1] %v1342_v54 }
  0xbc   :  { %1998 = vst [vmem:[%s2969_s1 + $0x50] sm:$0x1] %v1406_v55  ;;  %2006 = vst [vmem:[%s2969_s1 + $0x58] sm:$0x1] %v1470_v56 }
  0xbd   :  { %357 = vst.msk [vmem:[#allocation0 + $0x39] sm:$0x1] %vm67_vm1, %v2109_v60   ;;  %359 = vst.msk [vmem:[#allocation0 + $0x78] sm:$0x2] %vm67_vm1, %v2109_v60  }
  0xbe   :  { %361 = vst.msk [vmem:[#allocation0 + $0xb7] sm:$0x4] %vm67_vm1, %v2109_v60   ;;  %363 = vst.msk [vmem:[#allocation0 + $0xf6] sm:$0x8] %vm67_vm1, %v2109_v60   ;;  %v1333_v49 = vld [vmem:[#allocation0 + $0x238] sm:$0x3] }
  0xbf   :  { %365 = vst.msk [vmem:[#allocation0 + $0x135] sm:$0x10] %vm67_vm1, %v2109_v60   ;;  %367 = vst.msk [vmem:[#allocation0 + $0x174] sm:$0x20] %vm67_vm1, %v2109_v60   ;;  %v1334_v57 = vpack.c.bf16 %v2161_v32, %v1333_v49  ;;  %v1461_v9 = vld [vmem:[#allocation0 + $0x2b8] sm:$0x3] }
  0xc0   :  { %369 = vst.msk [vmem:[#allocation0 + $0x1b3] sm:$0x40] %vm67_vm1, %v2109_v60   ;;  %371 = vst.msk [vmem:[#allocation0 + $0x1f2] sm:$0x80] %vm67_vm1, %v2109_v60   ;;  %v1589_v11 = vld [vmem:[#allocation0 + $0x338] sm:$0x3] }
  0xc1   :  { %2014 = vst [vmem:[%s2969_s1 + $0x60] sm:$0x1] %v1534_v61  ;;  %2022 = vst [vmem:[%s2969_s1 + $0x68] sm:$0x1] %v1598_v62  ;;  %v1717_v47 = vld [vmem:[#allocation0 + $0x3b8] sm:$0x3] }
  0xc2   :  { %2030 = vst [vmem:[%s2969_s1 + $0x70] sm:$0x1] %v1662_v63  ;;  %336 = vst.msk [vmem:[#allocation0 + $0x209] sm:$0x1] %vm67_vm1, %v2105_v3   ;;  %v1781_v48 = vld [vmem:[#allocation0 + $0x3f8] sm:$0x3]  ;;  %v1718_v54 = vpack.c.bf16 %v2161_v32, %v1717_v47 }
  0xc3   :  { %338 = vst.msk [vmem:[#allocation0 + $0x248] sm:$0x2] %vm67_vm1, %v2105_v3   ;;  %340 = vst.msk [vmem:[#allocation0 + $0x287] sm:$0x4] %vm67_vm1, %v2105_v3   ;;  %v1782_v55 = vpack.c.bf16 %v2161_v32, %v1781_v48  ;;  %v1653_v16 = vld [vmem:[#allocation0 + $0x378] sm:$0x3] }
  0xc4   :  { %342 = vst.msk [vmem:[#allocation0 + $0x2c6] sm:$0x8] %vm67_vm1, %v2105_v3   ;;  %344 = vst.msk [vmem:[#allocation0 + $0x305] sm:$0x10] %vm67_vm1, %v2105_v3   ;;  %v821_v56 = vld [vmem:[#allocation0 + $0x38] sm:$0x3] }
  0xc5   :  { %346 = vst.msk [vmem:[#allocation0 + $0x344] sm:$0x20] %vm67_vm1, %v2105_v3   ;;  %348 = vst.msk [vmem:[#allocation0 + $0x383] sm:$0x40] %vm67_vm1, %v2105_v3   ;;  %v885_v60 = vld [vmem:[#allocation0 + $0x78] sm:$0x3]  ;;  %v822_v63 = vpack.c.bf16 %v2161_v32, %v821_v56 }
  0xc6   :  { %350 = vst.msk [vmem:[#allocation0 + $0x3c2] sm:$0x80] %vm67_vm1, %v2105_v3   ;;  %2038 = vst [vmem:[%s2969_s1 + $0x78] sm:$0x1] %v1726_v4  ;;  %v949_v61 = vld [vmem:[#allocation0 + $0xb8] sm:$0x3] }
  0xc7   :  { %1988 = vst [vmem:[%s2969_s1 + $0x46] sm:$0x1] %v1326_v5  ;;  %1996 = vst [vmem:[%s2969_s1 + $0x4e] sm:$0x1] %v1390_v6  ;;  %v1205_v52 = vld [vmem:[#allocation0 + $0x1b8] sm:$0x3]  ;;  %v886_v5 = vpack.c.bf16 %v2161_v32, %v885_v60  ;;  %v950_v6 = vpack.c.bf16 %v2161_v32, %v949_v61 }
  0xc8   :  { %315 = vst.msk [vmem:[#allocation0 + $0x9] sm:$0x1] %vm67_vm1, %v2104_v10   ;;  %317 = vst.msk [vmem:[#allocation0 + $0x48] sm:$0x2] %vm67_vm1, %v2104_v10   ;;  %v1269_v53 = vld [vmem:[#allocation0 + $0x1f8] sm:$0x3]  ;;  %v1206_v58 = vpack.c.bf16 %v2161_v32, %v1205_v52 }
  0xc9   :  { %319 = vst.msk [vmem:[#allocation0 + $0x87] sm:$0x4] %vm67_vm1, %v2104_v10   ;;  %321 = vst.msk [vmem:[#allocation0 + $0xc6] sm:$0x8] %vm67_vm1, %v2104_v10   ;;  %v1270_v59 = vpack.c.bf16 %v2161_v32, %v1269_v53  ;;  %v1013_v62 = vld [vmem:[#allocation0 + $0xf8] sm:$0x3] }
  0xca   :  { %323 = vst.msk [vmem:[#allocation0 + $0x105] sm:$0x10] %vm67_vm1, %v2104_v10   ;;  %325 = vst.msk [vmem:[#allocation0 + $0x144] sm:$0x20] %vm67_vm1, %v2104_v10   ;;  %v1077_v2 = vld [vmem:[#allocation0 + $0x138] sm:$0x3]  ;;  %v1014_v7 = vpack.c.bf16 %v2161_v32, %v1013_v62 }
  0xcb   :  { %327 = vst.msk [vmem:[#allocation0 + $0x183] sm:$0x40] %vm67_vm1, %v2104_v10   ;;  %329 = vst.msk [vmem:[#allocation0 + $0x1c2] sm:$0x80] %vm67_vm1, %v2104_v10   ;;  %v1141_v3 = vld [vmem:[#allocation0 + $0x178] sm:$0x3]  ;;  %v1078_v12 = vpack.c.bf16 %v2161_v32, %v1077_v2 }
  0xcc   :  { %2004 = vst [vmem:[%s2969_s1 + $0x56] sm:$0x1] %v1454_v13  ;;  %2012 = vst [vmem:[%s2969_s1 + $0x5e] sm:$0x1] %v1518_v14  ;;  %v1397_v4 = vld [vmem:[#allocation0 + $0x278] sm:$0x3]  ;;  %v1142_v13 = vpack.c.bf16 %v2161_v32, %v1141_v3 }
  0xcd   :  { %2020 = vst [vmem:[%s2969_s1 + $0x66] sm:$0x1] %v1582_v15  ;;  %460 = vst.msk [vmem:[#allocation0 + $0x211] sm:$0x1] %vm67_vm1, %v2120_v19   ;;  %v1525_v10 = vld [vmem:[#allocation0 + $0x2f8] sm:$0x3]  ;;  %v1398_v14 = vpack.c.bf16 %v2161_v32, %v1397_v4  ;;  %v2139_v15 = vunpack.i.l.bf16 %v2138_v0 }
  0xce   :  { %462 = vst.msk [vmem:[#allocation0 + $0x250] sm:$0x2] %vm67_vm1, %v2120_v19   ;;  %464 = vst.msk [vmem:[#allocation0 + $0x28f] sm:$0x4] %vm67_vm1, %v2120_v19   ;;  %v1669_v17 = vld [vmem:[#allocation0 + $0x388] sm:$0x3] }
  0xcf   :  { %466 = vst.msk [vmem:[#allocation0 + $0x2ce] sm:$0x8] %vm67_vm1, %v2120_v19   ;;  %468 = vst.msk [vmem:[#allocation0 + $0x30d] sm:$0x10] %vm67_vm1, %v2120_v19   ;;  %v774_v18 = vld [vmem:[#allocation0 + $0x8] sm:$0x3]  ;;  %v1670_v23 = vpack.c.bf16 %v2161_v32, %v1669_v17 }
  0xd0   :  { %470 = vst.msk [vmem:[#allocation0 + $0x34c] sm:$0x20] %vm67_vm1, %v2120_v19   ;;  %472 = vst.msk [vmem:[#allocation0 + $0x38b] sm:$0x40] %vm67_vm1, %v2120_v19   ;;  %v837_v24 = vld [vmem:[#allocation0 + $0x48] sm:$0x3] }
  0xd1   :  { %474 = vst.msk [vmem:[#allocation0 + $0x3ca] sm:$0x80] %vm67_vm1, %v2120_v19   ;;  %2028 = vst [vmem:[%s2969_s1 + $0x6e] sm:$0x1] %v1646_v20  ;;  %v1462_v19 = vpack.c.bf16 %v2161_v32, %v1461_v9  ;;  %v1526_v20 = vpack.c.bf16 %v2161_v32, %v1525_v10  ;;  %v901_v25 = vld [vmem:[#allocation0 + $0x88] sm:$0x3]  ;;  %v838_v35 = vpack.c.bf16 %v2161_v32, %v837_v24 }
  0xd2   :  { %1940 = vst [vmem:[%s2969_s1 + $0x16] sm:$0x1] %v942_v21  ;;  %1948 = vst [vmem:[%s2969_s1 + $0x1e] sm:$0x1] %v1006_v22  ;;  %v1590_v21 = vpack.c.bf16 %v2161_v32, %v1589_v11  ;;  %v2135_v22 = vunpack.i.h.bf16 %v2133_v1  ;;  %v1029_v31 = vld [vmem:[#allocation0 + $0x108] sm:$0x3]  ;;  %v902_v36 = vpack.c.bf16 %v2161_v32, %v901_v25 }
  0xd3   :  { %439 = vst.msk [vmem:[#allocation0 + $0x11] sm:$0x1] %vm67_vm1, %v2119_v26   ;;  %441 = vst.msk [vmem:[#allocation0 + $0x50] sm:$0x2] %vm67_vm1, %v2119_v26   ;;  %v1093_v33 = vld [vmem:[#allocation0 + $0x148] sm:$0x3]  ;;  %v1030_v42 = vpack.c.bf16 %v2161_v32, %v1029_v31 }
  0xd4   :  { %443 = vst.msk [vmem:[#allocation0 + $0x8f] sm:$0x4] %vm67_vm1, %v2119_v26   ;;  %445 = vst.msk [vmem:[#allocation0 + $0xce] sm:$0x8] %vm67_vm1, %v2119_v26   ;;  %v1349_v41 = vld [vmem:[#allocation0 + $0x248] sm:$0x3] }
  0xd5   :  { %447 = vst.msk [vmem:[#allocation0 + $0x10d] sm:$0x10] %vm67_vm1, %v2119_v26   ;;  %449 = vst.msk [vmem:[#allocation0 + $0x14c] sm:$0x20] %vm67_vm1, %v2119_v26   ;;  %v1477_v47 = vld [vmem:[#allocation0 + $0x2c8] sm:$0x3] }
  0xd6   :  { %451 = vst.msk [vmem:[#allocation0 + $0x18b] sm:$0x40] %vm67_vm1, %v2119_v26   ;;  %453 = vst.msk [vmem:[#allocation0 + $0x1ca] sm:$0x80] %vm67_vm1, %v2119_v26   ;;  %v965_v26 = vld [vmem:[#allocation0 + $0xc8] sm:$0x3] }
  0xd7   :  { %1956 = vst [vmem:[%s2969_s1 + $0x26] sm:$0x1] %v1070_v27  ;;  %1964 = vst [vmem:[%s2969_s1 + $0x2e] sm:$0x1] %v1134_v28  ;;  %v1654_v27 = vpack.c.bf16 %v2161_v32, %v1653_v16  ;;  %v775_v28 = vpack.c.bf16 %v2161_v32, %v774_v18  ;;  %v1541_v48 = vld [vmem:[#allocation0 + $0x308] sm:$0x3] }
  0xd8   :  { %1972 = vst [vmem:[%s2969_s1 + $0x36] sm:$0x1] %v1198_v29  ;;  %419 = vst.msk [vmem:[#allocation0 + $0x210] sm:$0x1] %vm67_vm1, %v2115_v34   ;;  %v2134_v29 = vunpack.i.l.bf16 %v2133_v1  ;;  %v1605_v52 = vld [vmem:[#allocation0 + $0x348] sm:$0x3]  ;;  %v1542_v56 = vpack.c.bf16 %v2161_v32, %v1541_v48 }
  0xd9   :  { %421 = vst.msk [vmem:[#allocation0 + $0x24f] sm:$0x2] %vm67_vm1, %v2115_v34   ;;  %423 = vst.msk [vmem:[#allocation0 + $0x28e] sm:$0x4] %vm67_vm1, %v2115_v34   ;;  %v1733_v53 = vld [vmem:[#allocation0 + $0x3c8] sm:$0x3] }
  0xda   :  { %425 = vst.msk [vmem:[#allocation0 + $0x2cd] sm:$0x8] %vm67_vm1, %v2115_v34   ;;  %427 = vst.msk [vmem:[#allocation0 + $0x30c] sm:$0x10] %vm67_vm1, %v2115_v34  }
  0xdb   :  { %429 = vst.msk [vmem:[#allocation0 + $0x34b] sm:$0x20] %vm67_vm1, %v2115_v34   ;;  %431 = vst.msk [vmem:[#allocation0 + $0x38a] sm:$0x40] %vm67_vm1, %v2115_v34  }
  0xdc   :  { %433 = vst.msk [vmem:[#allocation0 + $0x3c9] sm:$0x80] %vm67_vm1, %v2115_v34   ;;  %1924 = vst [vmem:[%s2969_s1 + $0x6] sm:$0x1] %v814_v37  ;;  %v1157_v34 = vld [vmem:[#allocation0 + $0x188] sm:$0x3]  ;;  %v966_v37 = vpack.c.bf16 %v2161_v32, %v965_v26 }
  0xdd   :  { %1932 = vst [vmem:[%s2969_s1 + $0xe] sm:$0x1] %v878_v38  ;;  %1980 = vst [vmem:[%s2969_s1 + $0x3e] sm:$0x1] %v1262_v39  ;;  %v2145_v38 = vunpack.i.h.bf16 %v2143_v30  ;;  %v1221_v39 = vld [vmem:[#allocation0 + $0x1c8] sm:$0x3] }
  0xde   :  { %398 = vst.msk [vmem:[#allocation0 + $0x10] sm:$0x1] %vm67_vm1, %v2114_v40   ;;  %400 = vst.msk [vmem:[#allocation0 + $0x4f] sm:$0x2] %vm67_vm1, %v2114_v40   ;;  %v1222_v49 = vpack.c.bf16 %v2161_v32, %v1221_v39 }
  0xdf   :  { %402 = vst.msk [vmem:[#allocation0 + $0x8e] sm:$0x4] %vm67_vm1, %v2114_v40   ;;  %404 = vst.msk [vmem:[#allocation0 + $0xcd] sm:$0x8] %vm67_vm1, %v2114_v40  }
  0xe0   :  { %406 = vst.msk [vmem:[#allocation0 + $0x10c] sm:$0x10] %vm67_vm1, %v2114_v40   ;;  %408 = vst.msk [vmem:[#allocation0 + $0x14b] sm:$0x20] %vm67_vm1, %v2114_v40   ;;  %v1357_v61 = vld [vmem:[#allocation0 + $0x250] sm:$0x3] }
  0xe1   :  { %410 = vst.msk [vmem:[#allocation0 + $0x18a] sm:$0x40] %vm67_vm1, %v2114_v40   ;;  %412 = vst.msk [vmem:[#allocation0 + $0x1c9] sm:$0x80] %vm67_vm1, %v2114_v40   ;;  %v1285_v40 = vld [vmem:[#allocation0 + $0x208] sm:$0x3]  ;;  %v1358_v0 = vpack.c.bf16 %v2161_v32, %v1357_v61 }
  0xe2   :  { %2036 = vst [vmem:[%s2969_s1 + $0x76] sm:$0x1] %v1710_v43  ;;  %2044 = vst [vmem:[%s2969_s1 + $0x7e] sm:$0x1] %v1774_v44  ;;  %v1094_v43 = vpack.c.bf16 %v2161_v32, %v1093_v33  ;;  %v1158_v44 = vpack.c.bf16 %v2161_v32, %v1157_v34  ;;  %v1485_v62 = vld [vmem:[#allocation0 + $0x2d0] sm:$0x3] }
  0xe3   :  { %542 = vst.msk [vmem:[#allocation0 + $0x219] sm:$0x1] %vm67_vm1, %v2130_v45   ;;  %544 = vst.msk [vmem:[#allocation0 + $0x258] sm:$0x2] %vm67_vm1, %v2130_v45   ;;  %v1486_v1 = vpack.c.bf16 %v2161_v32, %v1485_v62  ;;  %v1613_v3 = vld [vmem:[#allocation0 + $0x350] sm:$0x3] }
  0xe4   :  { %546 = vst.msk [vmem:[#allocation0 + $0x297] sm:$0x4] %vm67_vm1, %v2130_v45   ;;  %548 = vst.msk [vmem:[#allocation0 + $0x2d6] sm:$0x8] %vm67_vm1, %v2130_v45   ;;  %v1421_v18 = vld [vmem:[#allocation0 + $0x290] sm:$0x3] }
  0xe5   :  { %550 = vst.msk [vmem:[#allocation0 + $0x315] sm:$0x10] %vm67_vm1, %v2130_v45   ;;  %552 = vst.msk [vmem:[#allocation0 + $0x354] sm:$0x20] %vm67_vm1, %v2130_v45   ;;  %v781_v4 = vld [vmem:[#allocation0 + $0x10] sm:$0x3]  ;;  %v1422_v24 = vpack.c.bf16 %v2161_v32, %v1421_v18 }
  0xe6   :  { %554 = vst.msk [vmem:[#allocation0 + $0x393] sm:$0x40] %vm67_vm1, %v2130_v45   ;;  %556 = vst.msk [vmem:[#allocation0 + $0x3d2] sm:$0x80] %vm67_vm1, %v2130_v45   ;;  %v2144_v45 = vunpack.i.l.bf16 %v2143_v30  ;;  %v909_v9 = vld [vmem:[#allocation0 + $0x90] sm:$0x3] }
  0xe7   :  { %521 = vst.msk [vmem:[#allocation0 + $0x19] sm:$0x1] %vm67_vm1, %v2129_v46   ;;  %523 = vst.msk [vmem:[#allocation0 + $0x58] sm:$0x2] %vm67_vm1, %v2129_v46   ;;  %v973_v10 = vld [vmem:[#allocation0 + $0xd0] sm:$0x3] }
  0xe8   :  { %525 = vst.msk [vmem:[#allocation0 + $0x97] sm:$0x4] %vm67_vm1, %v2129_v46   ;;  %527 = vst.msk [vmem:[#allocation0 + $0xd6] sm:$0x8] %vm67_vm1, %v2129_v46   ;;  %v1037_v11 = vld [vmem:[#allocation0 + $0x110] sm:$0x3] }
  0xe9   :  { %529 = vst.msk [vmem:[#allocation0 + $0x115] sm:$0x10] %vm67_vm1, %v2129_v46   ;;  %531 = vst.msk [vmem:[#allocation0 + $0x154] sm:$0x20] %vm67_vm1, %v2129_v46   ;;  %v1165_v16 = vld [vmem:[#allocation0 + $0x190] sm:$0x3] }
  0xea   :  { %533 = vst.msk [vmem:[#allocation0 + $0x193] sm:$0x40] %vm67_vm1, %v2129_v46   ;;  %535 = vst.msk [vmem:[#allocation0 + $0x1d2] sm:$0x80] %vm67_vm1, %v2129_v46   ;;  %v1413_v46 = vld [vmem:[#allocation0 + $0x288] sm:$0x3] }
  0xeb   :  { %501 = vst.msk [vmem:[#allocation0 + $0x218] sm:$0x1] %vm67_vm1, %v2125_v50   ;;  %503 = vst.msk [vmem:[#allocation0 + $0x257] sm:$0x2] %vm67_vm1, %v2125_v50   ;;  %v1229_v17 = vld [vmem:[#allocation0 + $0x1d0] sm:$0x3] }
  0xec   :  { %505 = vst.msk [vmem:[#allocation0 + $0x296] sm:$0x4] %vm67_vm1, %v2125_v50   ;;  %507 = vst.msk [vmem:[#allocation0 + $0x2d5] sm:$0x8] %vm67_vm1, %v2125_v50  }
  0xed   :  { %509 = vst.msk [vmem:[#allocation0 + $0x314] sm:$0x10] %vm67_vm1, %v2125_v50   ;;  %511 = vst.msk [vmem:[#allocation0 + $0x353] sm:$0x20] %vm67_vm1, %v2125_v50  }
  0xee   :  { %513 = vst.msk [vmem:[#allocation0 + $0x392] sm:$0x40] %vm67_vm1, %v2125_v50   ;;  %515 = vst.msk [vmem:[#allocation0 + $0x3d1] sm:$0x80] %vm67_vm1, %v2125_v50   ;;  %v1286_v50 = vpack.c.bf16 %v2161_v32, %v1285_v40 }
  0xef   :  { %480 = vst.msk [vmem:[#allocation0 + $0x18] sm:$0x1] %vm67_vm1, %v2124_v51   ;;  %482 = vst.msk [vmem:[#allocation0 + $0x57] sm:$0x2] %vm67_vm1, %v2124_v51  }
  0xf0   :  { %484 = vst.msk [vmem:[#allocation0 + $0x96] sm:$0x4] %vm67_vm1, %v2124_v51   ;;  %486 = vst.msk [vmem:[#allocation0 + $0xd5] sm:$0x8] %vm67_vm1, %v2124_v51  }
  0xf1   :  { %488 = vst.msk [vmem:[#allocation0 + $0x114] sm:$0x10] %vm67_vm1, %v2124_v51   ;;  %490 = vst.msk [vmem:[#allocation0 + $0x153] sm:$0x20] %vm67_vm1, %v2124_v51  }
  0xf2   :  { %492 = vst.msk [vmem:[#allocation0 + $0x192] sm:$0x40] %vm67_vm1, %v2124_v51   ;;  %494 = vst.msk [vmem:[#allocation0 + $0x1d1] sm:$0x80] %vm67_vm1, %v2124_v51   ;;  %v1350_v51 = vpack.c.bf16 %v2161_v32, %v1349_v41 }
  0xf3   :  { %2037 = vst [vmem:[%s2969_s1 + $0x77] sm:$0x1] %v1718_v54  ;;  %2045 = vst [vmem:[%s2969_s1 + $0x7f] sm:$0x1] %v1782_v55  ;;  %v1414_v54 = vpack.c.bf16 %v2161_v32, %v1413_v46  ;;  %v1478_v55 = vpack.c.bf16 %v2161_v32, %v1477_v47  ;;  %v1429_v46 = vld [vmem:[#allocation0 + $0x298] sm:$0x3] }
  0xf4   :  { %1989 = vst [vmem:[%s2969_s1 + $0x47] sm:$0x1] %v1334_v57  ;;  %1973 = vst [vmem:[%s2969_s1 + $0x37] sm:$0x1] %v1206_v58  ;;  %v1293_v57 = vld [vmem:[#allocation0 + $0x210] sm:$0x3]  ;;  %v1606_v58 = vpack.c.bf16 %v2161_v32, %v1605_v52 }
  0xf5   :  { %1981 = vst [vmem:[%s2969_s1 + $0x3f] sm:$0x1] %v1270_v59  ;;  %1925 = vst [vmem:[%s2969_s1 + $0x7] sm:$0x1] %v822_v63  ;;  %v1734_v59 = vpack.c.bf16 %v2161_v32, %v1733_v53  ;;  %v1294_v60 = vpack.c.bf16 %v2161_v32, %v1293_v57  ;;  %v1549_v63 = vld [vmem:[#allocation0 + $0x310] sm:$0x3] }
  0xf6   :  { %1933 = vst [vmem:[%s2969_s1 + $0xf] sm:$0x1] %v886_v5  ;;  %1941 = vst [vmem:[%s2969_s1 + $0x17] sm:$0x1] %v950_v6  ;;  %v1550_v2 = vpack.c.bf16 %v2161_v32, %v1549_v63  ;;  %v845_v5 = vld [vmem:[#allocation0 + $0x50] sm:$0x3]  ;;  %v1614_v6 = vpack.c.bf16 %v2161_v32, %v1613_v3 }
  0xf7   :  { %1949 = vst [vmem:[%s2969_s1 + $0x1f] sm:$0x1] %v1014_v7  ;;  %624 = vst.msk [vmem:[#allocation0 + $0x221] sm:$0x1] %vm67_vm1, %v2140_v8   ;;  %v782_v7 = vpack.c.bf16 %v2161_v32, %v781_v4  ;;  %v917_v34 = vld [vmem:[#allocation0 + $0x98] sm:$0x3] }
  0xf8   :  { %626 = vst.msk [vmem:[#allocation0 + $0x260] sm:$0x2] %vm67_vm1, %v2140_v8   ;;  %628 = vst.msk [vmem:[#allocation0 + $0x29f] sm:$0x4] %vm67_vm1, %v2140_v8   ;;  %v1045_v41 = vld [vmem:[#allocation0 + $0x118] sm:$0x3] }
  0xf9   :  { %630 = vst.msk [vmem:[#allocation0 + $0x2de] sm:$0x8] %vm67_vm1, %v2140_v8   ;;  %632 = vst.msk [vmem:[#allocation0 + $0x31d] sm:$0x10] %vm67_vm1, %v2140_v8   ;;  %v1237_v40 = vld [vmem:[#allocation0 + $0x1d8] sm:$0x3]  ;;  %v1046_v47 = vpack.c.bf16 %v2161_v32, %v1045_v41 }
  0xfa   :  { %634 = vst.msk [vmem:[#allocation0 + $0x35c] sm:$0x20] %vm67_vm1, %v2140_v8   ;;  %636 = vst.msk [vmem:[#allocation0 + $0x39b] sm:$0x40] %vm67_vm1, %v2140_v8  }
  0xfb   :  { %638 = vst.msk [vmem:[#allocation0 + $0x3da] sm:$0x80] %vm67_vm1, %v2140_v8   ;;  %1957 = vst [vmem:[%s2969_s1 + $0x27] sm:$0x1] %v1078_v12  ;;  %v846_v8 = vpack.c.bf16 %v2161_v32, %v845_v5  ;;  %v910_v12 = vpack.c.bf16 %v2161_v32, %v909_v9 }
  0xfc   :  { %1965 = vst [vmem:[%s2969_s1 + $0x2f] sm:$0x1] %v1142_v13  ;;  %1997 = vst [vmem:[%s2969_s1 + $0x4f] sm:$0x1] %v1398_v14  ;;  %v974_v13 = vpack.c.bf16 %v2161_v32, %v973_v10  ;;  %v1038_v14 = vpack.c.bf16 %v2161_v32, %v1037_v11 }
  0xfd   :  { %603 = vst.msk [vmem:[#allocation0 + $0x21] sm:$0x1] %vm67_vm1, %v2139_v15   ;;  %605 = vst.msk [vmem:[#allocation0 + $0x60] sm:$0x2] %vm67_vm1, %v2139_v15  }
  0xfe   :  { %607 = vst.msk [vmem:[#allocation0 + $0x9f] sm:$0x4] %vm67_vm1, %v2139_v15   ;;  %609 = vst.msk [vmem:[#allocation0 + $0xde] sm:$0x8] %vm67_vm1, %v2139_v15  }
  0xff   :  { %611 = vst.msk [vmem:[#allocation0 + $0x11d] sm:$0x10] %vm67_vm1, %v2139_v15   ;;  %613 = vst.msk [vmem:[#allocation0 + $0x15c] sm:$0x20] %vm67_vm1, %v2139_v15  }
 0x100   :  { %615 = vst.msk [vmem:[#allocation0 + $0x19b] sm:$0x40] %vm67_vm1, %v2139_v15   ;;  %617 = vst.msk [vmem:[#allocation0 + $0x1da] sm:$0x80] %vm67_vm1, %v2139_v15   ;;  %v1101_v15 = vld [vmem:[#allocation0 + $0x150] sm:$0x3] }
 0x101   :  { %2005 = vst [vmem:[%s2969_s1 + $0x57] sm:$0x1] %v1462_v19  ;;  %2013 = vst [vmem:[%s2969_s1 + $0x5f] sm:$0x1] %v1526_v20  ;;  %v1677_v19 = vld [vmem:[#allocation0 + $0x390] sm:$0x3] }
 0x102   :  { %2021 = vst [vmem:[%s2969_s1 + $0x67] sm:$0x1] %v1590_v21  ;;  %583 = vst.msk [vmem:[#allocation0 + $0x220] sm:$0x1] %vm67_vm1, %v2135_v22   ;;  %v1741_v20 = vld [vmem:[#allocation0 + $0x3d0] sm:$0x3]  ;;  %v1102_v21 = vpack.c.bf16 %v2161_v32, %v1101_v15  ;;  %v1678_v25 = vpack.c.bf16 %v2161_v32, %v1677_v19 }
 0x103   :  { %585 = vst.msk [vmem:[#allocation0 + $0x25f] sm:$0x2] %vm67_vm1, %v2135_v22   ;;  %587 = vst.msk [vmem:[#allocation0 + $0x29e] sm:$0x4] %vm67_vm1, %v2135_v22   ;;  %v1742_v26 = vpack.c.bf16 %v2161_v32, %v1741_v20 }
 0x104   :  { %589 = vst.msk [vmem:[#allocation0 + $0x2dd] sm:$0x8] %vm67_vm1, %v2135_v22   ;;  %591 = vst.msk [vmem:[#allocation0 + $0x31c] sm:$0x10] %vm67_vm1, %v2135_v22  }
 0x105   :  { %593 = vst.msk [vmem:[#allocation0 + $0x35b] sm:$0x20] %vm67_vm1, %v2135_v22   ;;  %595 = vst.msk [vmem:[#allocation0 + $0x39a] sm:$0x40] %vm67_vm1, %v2135_v22  }
 0x106   :  { %597 = vst.msk [vmem:[#allocation0 + $0x3d9] sm:$0x80] %vm67_vm1, %v2135_v22   ;;  %2031 = vst [vmem:[%s2969_s1 + $0x71] sm:$0x1] %v1670_v23  ;;  %v1166_v22 = vpack.c.bf16 %v2161_v32, %v1165_v16  ;;  %v1230_v23 = vpack.c.bf16 %v2161_v32, %v1229_v17 }
 0x107   :  { %2029 = vst [vmem:[%s2969_s1 + $0x6f] sm:$0x1] %v1654_v27  ;;  %1919 = vst [vmem:[%s2969_s1 + $0x1] sm:$0x1] %v775_v28  ;;  %v1749_v27 = vld [vmem:[#allocation0 + $0x3d8] sm:$0x3] }
 0x108   :  { %562 = vst.msk [vmem:[#allocation0 + $0x20] sm:$0x1] %vm67_vm1, %v2134_v29   ;;  %564 = vst.msk [vmem:[#allocation0 + $0x5f] sm:$0x2] %vm67_vm1, %v2134_v29   ;;  %v789_v28 = vld [vmem:[#allocation0 + $0x18] sm:$0x3]  ;;  %v1750_v30 = vpack.c.bf16 %v2161_v32, %v1749_v27 }
 0x109   :  { %566 = vst.msk [vmem:[#allocation0 + $0x9e] sm:$0x4] %vm67_vm1, %v2134_v29   ;;  %568 = vst.msk [vmem:[#allocation0 + $0xdd] sm:$0x8] %vm67_vm1, %v2134_v29   ;;  %v790_v31 = vpack.c.bf16 %v2161_v32, %v789_v28  ;;  %v1309_v9 = vld [vmem:[#allocation0 + $0x220] sm:$0x3] }
 0x10a   :  { %570 = vst.msk [vmem:[#allocation0 + $0x11c] sm:$0x10] %vm67_vm1, %v2134_v29   ;;  %572 = vst.msk [vmem:[#allocation0 + $0x15b] sm:$0x20] %vm67_vm1, %v2134_v29   ;;  %v1373_v10 = vld [vmem:[#allocation0 + $0x260] sm:$0x3]  ;;  %v1310_v18 = vpack.c.bf16 %v2161_v32, %v1309_v9 }
 0x10b   :  { %574 = vst.msk [vmem:[#allocation0 + $0x19a] sm:$0x40] %vm67_vm1, %v2134_v29   ;;  %576 = vst.msk [vmem:[#allocation0 + $0x1d9] sm:$0x80] %vm67_vm1, %v2134_v29   ;;  %v853_v29 = vld [vmem:[#allocation0 + $0x58] sm:$0x3]  ;;  %v1374_v19 = vpack.c.bf16 %v2161_v32, %v1373_v10 }
 0x10c   :  { %1927 = vst [vmem:[%s2969_s1 + $0x9] sm:$0x1] %v838_v35  ;;  %1935 = vst [vmem:[%s2969_s1 + $0x11] sm:$0x1] %v902_v36  ;;  %v854_v33 = vpack.c.bf16 %v2161_v32, %v853_v29  ;;  %v981_v35 = vld [vmem:[#allocation0 + $0xd8] sm:$0x3] }
 0x10d   :  { %1943 = vst [vmem:[%s2969_s1 + $0x19] sm:$0x1] %v966_v37  ;;  %665 = vst.msk [vmem:[#allocation0 + $0x228] sm:$0x1] %vm67_vm1, %v2145_v38   ;;  %v1173_v36 = vld [vmem:[#allocation0 + $0x198] sm:$0x3]  ;;  %v918_v37 = vpack.c.bf16 %v2161_v32, %v917_v34 }
 0x10e   :  { %667 = vst.msk [vmem:[#allocation0 + $0x267] sm:$0x2] %vm67_vm1, %v2145_v38   ;;  %669 = vst.msk [vmem:[#allocation0 + $0x2a6] sm:$0x4] %vm67_vm1, %v2145_v38   ;;  %v1174_v39 = vpack.c.bf16 %v2161_v32, %v1173_v36  ;;  %v1437_v11 = vld [vmem:[#allocation0 + $0x2a0] sm:$0x3] }
 0x10f   :  { %671 = vst.msk [vmem:[#allocation0 + $0x2e5] sm:$0x8] %vm67_vm1, %v2145_v38   ;;  %673 = vst.msk [vmem:[#allocation0 + $0x324] sm:$0x10] %vm67_vm1, %v2145_v38   ;;  %v1501_v15 = vld [vmem:[#allocation0 + $0x2e0] sm:$0x3]  ;;  %v1438_v20 = vpack.c.bf16 %v2161_v32, %v1437_v11 }
 0x110   :  { %675 = vst.msk [vmem:[#allocation0 + $0x363] sm:$0x20] %vm67_vm1, %v2145_v38   ;;  %677 = vst.msk [vmem:[#allocation0 + $0x3a2] sm:$0x40] %vm67_vm1, %v2145_v38   ;;  %v925_v62 = vld [vmem:[#allocation0 + $0xa0] sm:$0x3] }
 0x111   :  { %679 = vst.msk [vmem:[#allocation0 + $0x3e1] sm:$0x80] %vm67_vm1, %v2145_v38   ;;  %1951 = vst [vmem:[%s2969_s1 + $0x21] sm:$0x1] %v1030_v42  ;;  %v982_v38 = vpack.c.bf16 %v2161_v32, %v981_v35  ;;  %v1109_v42 = vld [vmem:[#allocation0 + $0x158] sm:$0x3] }
 0x112   :  { %1959 = vst [vmem:[%s2969_s1 + $0x29] sm:$0x1] %v1094_v43  ;;  %1967 = vst [vmem:[%s2969_s1 + $0x31] sm:$0x1] %v1158_v44  ;;  %v1238_v43 = vpack.c.bf16 %v2161_v32, %v1237_v40  ;;  %v1301_v44 = vld [vmem:[#allocation0 + $0x218] sm:$0x3]  ;;  %v1110_v48 = vpack.c.bf16 %v2161_v32, %v1109_v42 }
 0x113   :  { %644 = vst.msk [vmem:[#allocation0 + $0x28] sm:$0x1] %vm67_vm1, %v2144_v45   ;;  %646 = vst.msk [vmem:[#allocation0 + $0x67] sm:$0x2] %vm67_vm1, %v2144_v45   ;;  %v1302_v52 = vpack.c.bf16 %v2161_v32, %v1301_v44  ;;  %v989_v63 = vld [vmem:[#allocation0 + $0xe0] sm:$0x3] }
 0x114   :  { %648 = vst.msk [vmem:[#allocation0 + $0xa6] sm:$0x4] %vm67_vm1, %v2144_v45   ;;  %650 = vst.msk [vmem:[#allocation0 + $0xe5] sm:$0x8] %vm67_vm1, %v2144_v45   ;;  %v1117_v3 = vld [vmem:[#allocation0 + $0x160] sm:$0x3] }
 0x115   :  { %652 = vst.msk [vmem:[#allocation0 + $0x124] sm:$0x10] %vm67_vm1, %v2144_v45   ;;  %654 = vst.msk [vmem:[#allocation0 + $0x163] sm:$0x20] %vm67_vm1, %v2144_v45   ;;  %v1181_v4 = vld [vmem:[#allocation0 + $0x1a0] sm:$0x3] }
 0x116   :  { %656 = vst.msk [vmem:[#allocation0 + $0x1a2] sm:$0x40] %vm67_vm1, %v2144_v45   ;;  %658 = vst.msk [vmem:[#allocation0 + $0x1e1] sm:$0x80] %vm67_vm1, %v2144_v45   ;;  %v1365_v45 = vld [vmem:[#allocation0 + $0x258] sm:$0x3] }
 0x117   :  { %1975 = vst [vmem:[%s2969_s1 + $0x39] sm:$0x1] %v1222_v49  ;;  %1983 = vst [vmem:[%s2969_s1 + $0x41] sm:$0x1] %v1286_v50  ;;  %v1493_v49 = vld [vmem:[#allocation0 + $0x2d8] sm:$0x3]  ;;  %v1366_v53 = vpack.c.bf16 %v2161_v32, %v1365_v45 }
 0x118   :  { %1991 = vst [vmem:[%s2969_s1 + $0x49] sm:$0x1] %v1350_v51  ;;  %1999 = vst [vmem:[%s2969_s1 + $0x51] sm:$0x1] %v1414_v54  ;;  %v1557_v50 = vld [vmem:[#allocation0 + $0x318] sm:$0x3]  ;;  %v1430_v54 = vpack.c.bf16 %v2161_v32, %v1429_v46 }
 0x119   :  { %2007 = vst [vmem:[%s2969_s1 + $0x59] sm:$0x1] %v1478_v55  ;;  %2015 = vst [vmem:[%s2969_s1 + $0x61] sm:$0x1] %v1542_v56  ;;  %v1621_v51 = vld [vmem:[#allocation0 + $0x358] sm:$0x3]  ;;  %v1494_v56 = vpack.c.bf16 %v2161_v32, %v1493_v49  ;;  %v1558_v57 = vpack.c.bf16 %v2161_v32, %v1557_v50 }
 0x11a   :  { %1984 = vst [vmem:[%s2969_s1 + $0x42] sm:$0x1] %v1294_v60  ;;  %2023 = vst [vmem:[%s2969_s1 + $0x69] sm:$0x1] %v1606_v58  ;;  %v1685_v55 = vld [vmem:[#allocation0 + $0x398] sm:$0x3]  ;;  %v1622_v58 = vpack.c.bf16 %v2161_v32, %v1621_v51 }
 0x11b   :  { %2039 = vst [vmem:[%s2969_s1 + $0x79] sm:$0x1] %v1734_v59  ;;  %1992 = vst [vmem:[%s2969_s1 + $0x4a] sm:$0x1] %v1358_v0  ;;  %v797_v59 = vld [vmem:[#allocation0 + $0x20] sm:$0x3]  ;;  %v1686_v61 = vpack.c.bf16 %v2161_v32, %v1685_v55 }
 0x11c   :  { %2008 = vst [vmem:[%s2969_s1 + $0x5a] sm:$0x1] %v1486_v1  ;;  %2016 = vst [vmem:[%s2969_s1 + $0x62] sm:$0x1] %v1550_v2  ;;  %v861_v60 = vld [vmem:[#allocation0 + $0x60] sm:$0x3]  ;;  %v798_v1 = vpack.c.bf16 %v2161_v32, %v797_v59 }
 0x11d   :  { %2024 = vst [vmem:[%s2969_s1 + $0x6a] sm:$0x1] %v1614_v6  ;;  %1920 = vst [vmem:[%s2969_s1 + $0x2] sm:$0x1] %v782_v7  ;;  %v1053_v0 = vld [vmem:[#allocation0 + $0x120] sm:$0x3]  ;;  %v862_v2 = vpack.c.bf16 %v2161_v32, %v861_v60  ;;  %v926_v6 = vpack.c.bf16 %v2161_v32, %v925_v62  ;;  %v990_v7 = vpack.c.bf16 %v2161_v32, %v989_v63 }
 0x11e   :  { %1928 = vst [vmem:[%s2969_s1 + $0xa] sm:$0x1] %v846_v8  ;;  %1936 = vst [vmem:[%s2969_s1 + $0x12] sm:$0x1] %v910_v12  ;;  %v1245_v5 = vld [vmem:[#allocation0 + $0x1e0] sm:$0x3]  ;;  %v1054_v8 = vpack.c.bf16 %v2161_v32, %v1053_v0  ;;  %v1118_v12 = vpack.c.bf16 %v2161_v32, %v1117_v3 }
 0x11f   :  { %1944 = vst [vmem:[%s2969_s1 + $0x1a] sm:$0x1] %v974_v13  ;;  %1952 = vst [vmem:[%s2969_s1 + $0x22] sm:$0x1] %v1038_v14  ;;  %v1182_v13 = vpack.c.bf16 %v2161_v32, %v1181_v4  ;;  %v1246_v14 = vpack.c.bf16 %v2161_v32, %v1245_v5  ;;  %v1565_v16 = vld [vmem:[#allocation0 + $0x320] sm:$0x3] }
 0x120   :  { %1960 = vst [vmem:[%s2969_s1 + $0x2a] sm:$0x1] %v1102_v21  ;;  %1968 = vst [vmem:[%s2969_s1 + $0x32] sm:$0x1] %v1166_v22  ;;  %v1629_v17 = vld [vmem:[#allocation0 + $0x360] sm:$0x3] }
 0x121   :  { %1976 = vst [vmem:[%s2969_s1 + $0x3a] sm:$0x1] %v1230_v23  ;;  %2000 = vst [vmem:[%s2969_s1 + $0x52] sm:$0x1] %v1422_v24  ;;  %v1693_v21 = vld [vmem:[#allocation0 + $0x3a0] sm:$0x3]  ;;  %v1502_v24 = vpack.c.bf16 %v2161_v32, %v1501_v15 }
 0x122   :  { %2032 = vst [vmem:[%s2969_s1 + $0x72] sm:$0x1] %v1678_v25  ;;  %2040 = vst [vmem:[%s2969_s1 + $0x7a] sm:$0x1] %v1742_v26  ;;  %v1757_v22 = vld [vmem:[#allocation0 + $0x3e0] sm:$0x3]  ;;  %v1566_v25 = vpack.c.bf16 %v2161_v32, %v1565_v16  ;;  %v1630_v26 = vpack.c.bf16 %v2161_v32, %v1629_v17 }
 0x123   :  { %2041 = vst [vmem:[%s2969_s1 + $0x7b] sm:$0x1] %v1750_v30  ;;  %1921 = vst [vmem:[%s2969_s1 + $0x3] sm:$0x1] %v790_v31  ;;  %v805_v23 = vld [vmem:[#allocation0 + $0x28] sm:$0x3]  ;;  %v1694_v31 = vpack.c.bf16 %v2161_v32, %v1693_v21 }
 0x124   :  { %1929 = vst [vmem:[%s2969_s1 + $0xb] sm:$0x1] %v854_v33  ;;  %1937 = vst [vmem:[%s2969_s1 + $0x13] sm:$0x1] %v918_v37  ;;  %v806_v27 = vpack.c.bf16 %v2161_v32, %v805_v23  ;;  %v869_v28 = vld [vmem:[#allocation0 + $0x68] sm:$0x3]  ;;  %v1758_v33 = vpack.c.bf16 %v2161_v32, %v1757_v22 }
 0x125   :  { %1945 = vst [vmem:[%s2969_s1 + $0x1b] sm:$0x1] %v982_v38  ;;  %1969 = vst [vmem:[%s2969_s1 + $0x33] sm:$0x1] %v1174_v39  ;;  %v933_v29 = vld [vmem:[#allocation0 + $0xa8] sm:$0x3]  ;;  %v870_v34 = vpack.c.bf16 %v2161_v32, %v869_v28 }
 0x126   :  { %1977 = vst [vmem:[%s2969_s1 + $0x3b] sm:$0x1] %v1238_v43  ;;  %1953 = vst [vmem:[%s2969_s1 + $0x23] sm:$0x1] %v1046_v47  ;;  %v997_v30 = vld [vmem:[#allocation0 + $0xe8] sm:$0x3]  ;;  %v934_v35 = vpack.c.bf16 %v2161_v32, %v933_v29 }
 0x127   :  { %1961 = vst [vmem:[%s2969_s1 + $0x2b] sm:$0x1] %v1110_v48  ;;  %1985 = vst [vmem:[%s2969_s1 + $0x43] sm:$0x1] %v1302_v52  ;;  %v998_v36 = vpack.c.bf16 %v2161_v32, %v997_v30  ;;  %v1061_v37 = vld [vmem:[#allocation0 + $0x128] sm:$0x3] }
 0x128   :  { %1993 = vst [vmem:[%s2969_s1 + $0x4b] sm:$0x1] %v1366_v53  ;;  %2001 = vst [vmem:[%s2969_s1 + $0x53] sm:$0x1] %v1430_v54  ;;  %v1125_v38 = vld [vmem:[#allocation0 + $0x168] sm:$0x3]  ;;  %v1062_v40 = vpack.c.bf16 %v2161_v32, %v1061_v37 }
 0x129   :  { %2009 = vst [vmem:[%s2969_s1 + $0x5b] sm:$0x1] %v1494_v56  ;;  %2017 = vst [vmem:[%s2969_s1 + $0x63] sm:$0x1] %v1558_v57  ;;  %v1189_v39 = vld [vmem:[#allocation0 + $0x1a8] sm:$0x3]  ;;  %v1126_v41 = vpack.c.bf16 %v2161_v32, %v1125_v38 }
 0x12a   :  { %2025 = vst [vmem:[%s2969_s1 + $0x6b] sm:$0x1] %v1622_v58  ;;  %2033 = vst [vmem:[%s2969_s1 + $0x73] sm:$0x1] %v1686_v61  ;;  %v1190_v42 = vpack.c.bf16 %v2161_v32, %v1189_v39  ;;  %v1253_v43 = vld [vmem:[#allocation0 + $0x1e8] sm:$0x3] }
 0x12b   :  { %1922 = vst [vmem:[%s2969_s1 + $0x4] sm:$0x1] %v798_v1  ;;  %1930 = vst [vmem:[%s2969_s1 + $0xc] sm:$0x1] %v862_v2  ;;  %v1317_v44 = vld [vmem:[#allocation0 + $0x228] sm:$0x3]  ;;  %v1254_v46 = vpack.c.bf16 %v2161_v32, %v1253_v43 }
 0x12c   :  { %1938 = vst [vmem:[%s2969_s1 + $0x14] sm:$0x1] %v926_v6  ;;  %1946 = vst [vmem:[%s2969_s1 + $0x1c] sm:$0x1] %v990_v7  ;;  %v1381_v45 = vld [vmem:[#allocation0 + $0x268] sm:$0x3]  ;;  %v1318_v47 = vpack.c.bf16 %v2161_v32, %v1317_v44 }
 0x12d   :  { %1954 = vst [vmem:[%s2969_s1 + $0x24] sm:$0x1] %v1054_v8  ;;  %1962 = vst [vmem:[%s2969_s1 + $0x2c] sm:$0x1] %v1118_v12  ;;  %v1382_v48 = vpack.c.bf16 %v2161_v32, %v1381_v45  ;;  %v1445_v49 = vld [vmem:[#allocation0 + $0x2a8] sm:$0x3] }
 0x12e   :  { %1970 = vst [vmem:[%s2969_s1 + $0x34] sm:$0x1] %v1182_v13  ;;  %1978 = vst [vmem:[%s2969_s1 + $0x3c] sm:$0x1] %v1246_v14  ;;  %v1509_v50 = vld [vmem:[#allocation0 + $0x2e8] sm:$0x3]  ;;  %v1446_v52 = vpack.c.bf16 %v2161_v32, %v1445_v49 }
 0x12f   :  { %1986 = vst [vmem:[%s2969_s1 + $0x44] sm:$0x1] %v1310_v18  ;;  %1994 = vst [vmem:[%s2969_s1 + $0x4c] sm:$0x1] %v1374_v19  ;;  %v1573_v51 = vld [vmem:[#allocation0 + $0x328] sm:$0x3]  ;;  %v1510_v53 = vpack.c.bf16 %v2161_v32, %v1509_v50 }
 0x130   :  { %2002 = vst [vmem:[%s2969_s1 + $0x54] sm:$0x1] %v1438_v20  ;;  %2010 = vst [vmem:[%s2969_s1 + $0x5c] sm:$0x1] %v1502_v24  ;;  %v1574_v54 = vpack.c.bf16 %v2161_v32, %v1573_v51  ;;  %v1637_v55 = vld [vmem:[#allocation0 + $0x368] sm:$0x3] }
 0x131   :  { %2018 = vst [vmem:[%s2969_s1 + $0x64] sm:$0x1] %v1566_v25  ;;  %2026 = vst [vmem:[%s2969_s1 + $0x6c] sm:$0x1] %v1630_v26  ;;  %v1701_v56 = vld [vmem:[#allocation0 + $0x3a8] sm:$0x3]  ;;  %v1638_v58 = vpack.c.bf16 %v2161_v32, %v1637_v55 }
 0x132   :  { %1923 = vst [vmem:[%s2969_s1 + $0x5] sm:$0x1] %v806_v27  ;;  %2034 = vst [vmem:[%s2969_s1 + $0x74] sm:$0x1] %v1694_v31  ;;  %v1765_v57 = vld [vmem:[#allocation0 + $0x3e8] sm:$0x3]  ;;  %v1702_v59 = vpack.c.bf16 %v2161_v32, %v1701_v56 }
 0x133   :  { %2042 = vst [vmem:[%s2969_s1 + $0x7c] sm:$0x1] %v1758_v33  ;;  %1931 = vst [vmem:[%s2969_s1 + $0xd] sm:$0x1] %v870_v34  ;;  %v1766_v32 = vpack.c.bf16 %v2161_v32, %v1765_v57 }
 0x134   :  { %1939 = vst [vmem:[%s2969_s1 + $0x15] sm:$0x1] %v934_v35  ;;  %1947 = vst [vmem:[%s2969_s1 + $0x1d] sm:$0x1] %v998_v36 }
 0x135   :  { %1955 = vst [vmem:[%s2969_s1 + $0x25] sm:$0x1] %v1062_v40  ;;  %1963 = vst [vmem:[%s2969_s1 + $0x2d] sm:$0x1] %v1126_v41 }
 0x136   :  { %1971 = vst [vmem:[%s2969_s1 + $0x35] sm:$0x1] %v1190_v42  ;;  %1979 = vst [vmem:[%s2969_s1 + $0x3d] sm:$0x1] %v1254_v46 }
 0x137   :  { %1987 = vst [vmem:[%s2969_s1 + $0x45] sm:$0x1] %v1318_v47  ;;  %1995 = vst [vmem:[%s2969_s1 + $0x4d] sm:$0x1] %v1382_v48 }
 0x138   :  { %2003 = vst [vmem:[%s2969_s1 + $0x55] sm:$0x1] %v1446_v52  ;;  %2011 = vst [vmem:[%s2969_s1 + $0x5d] sm:$0x1] %v1510_v53 }
 0x139   :  { %2019 = vst [vmem:[%s2969_s1 + $0x65] sm:$0x1] %v1574_v54  ;;  %2027 = vst [vmem:[%s2969_s1 + $0x6d] sm:$0x1] %v1638_v58 }
 0x13a   :  { %2035 = vst [vmem:[%s2969_s1 + $0x75] sm:$0x1] %v1702_v59  ;;  %2043 = vst [vmem:[%s2969_s1 + $0x7d] sm:$0x1] %v1766_v32 }

// kernel: stem_forward.1
= control target key start
LH: loop header
LB: loop body
LE: loop exit
PB: predicated region body
PF: predicated region fallthrough
CT: control target
= control target key end

     0   :  { %s2454_s21 = smov 0   ;;  %s2456_s22 = smov 0   ;;  %s3102_s0 = inlined_call_operand.vmem [shape: f32[2,3,5,256], index: 0, kind: input, shape index: {}]   ;;  %s3103_s1 = inlined_call_operand.vmem [shape: f32[25,5], index: 1, kind: input, shape index: {}]   ;;  %s3104_s2 = inlined_call_operand.vmem [shape: f32[25,5], index: 2, kind: input, shape index: {}]   ;;  %s3105_s3 = inlined_call_operand.vmem [shape: f32[2,16,5], index: 3, kind: input, shape index: {}]   ;;  %s3106_s4 = inlined_call_operand.vmem [shape: f32[2,16,25], index: 4, kind: input, shape index: {}]   ;;  %s3107_s5 = inlined_call_operand.vmem [shape: f32[2,80,25], index: 5, kind: input, shape index: {}]   ;;  %s3108_s6 = inlined_call_operand.vmem [shape: f32[2,16,256], index: 6, kind: output, shape index: {}]  }
   0x1   :  { %s2458_s23 = smov 0  }
   0x2 LB: > { %s28_s24 = sadd.s32 1, %s2412_s22  ;;  %p2255_p0 = scmp.ge.s32.totalorder %s2416_s23, 1  ;;  %s2416_s23 = sphi %s2458_s23, %s16_s23   ;;  %s2412_s22 = sphi %s2456_s22, %s3113_s22   ;;  %s2408_s21 = sphi %s2454_s21, %s3112_s21  }
   0x3   : > { %p30_p1 = scmp.ge.s32.totalorder %s28_s24, 2  ;;  %p263_p2 = scmp.lt.s32.totalorder %s2416_s23, 3 }
   0x5   : > { %s3115_s24 = smov (%p30_p1, %s28_s24), 0  ;;  %p264_p3 = pnand %p2255_p0, %p263_p2 }
   0x6   : > { %p317_p4 = scmp.lt.s32.totalorder (!%p264_p3), %s2408_s21, 1 }
   0x7   : > { %267 = sbr.rel (%p264_p3) target bundleno = 787 (0x313), region = 44 }
   0xc   : > { %v3109_v0 = vmov 0.0   ;;  %s3117_s21 = smov (!%p317_p4, %s2408_s21), 1  ;;  %vm384_vm0 = vcmask 1044480   ;;  %v2485_v1 = vld [vmem:[%s3104_s2] sm:$0xff]  ;;  %vm371_vm1 = vcmask 39936   ;;  %v2527_v10 = vld [vmem:[%s3104_s2 + $0x8] sm:$0xff] }
   0xd   : > { %455 = vmatprep.mubr.f32.mxu0 %v3109_v0  ;;  %556 = vmatprep.mubr.f32.mxu1 %v3109_v0  ;;  %s2367_s25 = smul.u32 48, %s3117_s21  ;;  %v2490_v2 = vld [vmem:[%s3103_s1] sm:$0xff]  ;;  %v2532_v11 = vld [vmem:[%s3103_s1 + $0x8] sm:$0xff]  ;;  %v2548_v13 = vld [vmem:[%s3104_s2 + $0x10] sm:$0xff]  ;;  %vm636_vm2 = vcmask 1040384   ;;  %vm605_vm3 = vcmask 203776  }
   0xe   : > { %v2553_v14 = vld [vmem:[%s3103_s1 + $0x10] sm:$0xff]  ;;  %v358_v15 = vld [vmem:[%s3104_s2 + $0x18] sm:$0x1]  ;;  %s2362_s29 = sshll.u32 %s3117_s21, 4  ;;  %s2364_s12 = sshll.u32 %s3117_s21, 5 }
   0xf   : > { %s2480_s28 = scalar_lea.vmem %s3102_s0, %s2367_s25  ;;  %v2568_v16 = vld [vmem:[%s3103_s1 + $0x18] sm:$0x1]  ;;  %s2368_s25 = smul.u32 80, %s3117_s21 }
  0x10   : > { %v2493_v3 = vld [vmem:[%s2480_s28 + $0x8] sm:$0x1f]  ;;  %v2496_v4 = vld [vmem:[%s2480_s28] sm:$0x1f]  ;;  %v2289_v5 = vld [vmem:[%s2480_s28 + $0x18] sm:$0x1f]  ;;  %s335_s8 = scalar_lea.vmem %s3106_s4, %s2362_s29  ;;  %s330_s11 = scalar_lea.vmem %s3105_s3, %s2362_s29 }
  0x11   : > { %2264 = vmatprep.subr.msk.mxu0 %vm384_vm0, %v2493_v3  ;;  %2270 = vmatprep.subr.msk.mxu1 %vm384_vm0, %v2493_v3  ;;  %v2504_v6 = vsub.f32 %v2289_v5, %v2493_v3  ;;  %v2507_v7 = vld [vmem:[%s2480_s28 + $0x10] sm:$0x1f]  ;;  %v1048_v18 = vmul.f32 0.5, %v2493_v3  ;;  %v1047_v22 = vmul.f32 0.5, %v2496_v4  ;;  %v2321_v24 = vld [vmem:[%s2480_s28 + $0x28] sm:$0x1f]  ;;  %s349_s15 = scalar_lea.vmem %s3108_s6, %s2364_s12 }
  0x12   : > { %2265 = vmatpush1.msk.msra.mxu0 %vm384_vm0, %v2496_v4  ;;  %2271 = vmatpush1.msk.msra.mxu1 %vm384_vm0, %v2496_v4  ;;  %v2515_v8 = vsub.f32 %v2507_v7, %v2496_v4  ;;  %v2595_v26 = vsub.f32 %v2321_v24, %v2289_v5  ;;  %v2320_v27 = vld [vmem:[%s2480_s28 + $0x20] sm:$0x1f]  ;;  %s2693_s28 = scalar_lea.vmem %s3107_s5, %s2368_s25 }
  0x13   : > { %2266 = vmatmul.mubr.msk.f32.vlgmr.msra.gmra.mxu0 %vm371_vm1, %v2485_v1  ;;  %2272 = vmatmul.mubr.msk.f32.vlgmr.msra.gmra.mxu1 %vm371_vm1, %v2490_v2  ;;  %v949_v9 = vmul.f32 0.5, %v2504_v6  ;;  %v1050_v19 = vmul.f32 0.16666667, %v2504_v6  ;;  %v2612_v28 = vadd.f32 %v2504_v6, %v2493_v3  ;;  %v2618_v30 = vsub.f32 %v2320_v27, %v2507_v7  ;;  %v2713_v24 = vld [vmem:[%s2693_s28 + $0x10] sm:$0xff] }
  0x14   : > { %461 = vmatprep.mubr.f32.mxu0 %v3109_v0  ;;  %562 = vmatprep.mubr.f32.mxu1 %v3109_v0  ;;  %v948_v17 = vmul.f32 0.5, %v2515_v8  ;;  %v1049_v23 = vmul.f32 0.16666667, %v2515_v8  ;;  %v1494_v29 = vmul.f32 0.5, %v2595_v26  ;;  %v2636_v32 = vadd.f32 %v2515_v8, %v2496_v4 }
  0x15   : > { %2290 = vmatprep.subr.msk.mxu1 %vm384_vm0, %v2504_v6  ;;  %v951_v12 = vadd.f32 %v949_v9, %v2493_v3  ;;  %v1052_v21 = vadd.f32 %v1050_v19, %v1048_v18  ;;  %v1493_v33 = vmul.f32 0.5, %v2618_v30  ;;  %v2701_v18 = vld [vmem:[%s2693_s28] sm:$0xff] }
  0x16   : > { %2291 = vmatpush1.msk.msra.mxu1 %vm384_vm0, %v2515_v8  ;;  %v950_v20 = vadd.f32 %v948_v17, %v2496_v4  ;;  %v1051_v25 = vadd.f32 %v1049_v23, %v1047_v22  ;;  %v1496_v31 = vadd.f32 %v1494_v29, %v2612_v28 }
  0x17   : > { %2267 = vmatmul.mubr.msk.f32.gmra.mxu0 %vm371_vm1, %v2527_v10  ;;  %2273 = vmatmul.mubr.msk.f32.gmra.mxu1 %vm371_vm1, %v2532_v11  ;;  %v1495_v34 = vadd.f32 %v1493_v33, %v2636_v32 }
  0x18   : > { %467 = vmatprep.mubr.f32.mxu0 %v3109_v0  ;;  %568 = vmatprep.mubr.f32.mxu1 %v3109_v0 }
  0x19   : > { %2296 = vmatprep.subr.msk.mxu1 %vm384_vm0, %v951_v12 }
  0x1b   : > { %2268 = vmatmul.mubr.msk.f32.gmra.mxu0 %vm371_vm1, %v2548_v13  ;;  %2274 = vmatmul.mubr.msk.f32.gmra.mxu1 %vm371_vm1, %v2553_v14 }
  0x1c   : > { %473 = vmatprep.mubr.f32.mxu0 %v3109_v0  ;;  %574 = vmatprep.mubr.f32.mxu1 %v3109_v0 }
  0x1f   : > { %2269 = vmatmul.mubr.msk.f32.gmra.mxu0 %vm371_vm1, %v358_v15  ;;  %2275 = vmatmul.mubr.msk.f32.gmra.mxu1 %vm371_vm1, %v2568_v16 }
  0x20   : > { %923 = vmatprep.mubr.f32.mxu1 %v3109_v0  ;;  %707 = vmatprep.mubr.f32.mxu0 %v3109_v0 }
  0x23   : > { %2292 = vmatmul.mubr.msk.f32.vlgmr.msra.gmra.mxu1 %vm371_vm1, %v2485_v1 }
  0x24   : > { %929 = vmatprep.mubr.f32.mxu1 %v3109_v0  ;;  %2297 = vmatpush1.msk.msra.mxu1 %vm384_vm0, %v950_v20 }
  0x25   : > { %2302 = vmatprep.subr.msk.mxu1 %vm384_vm0, %v1052_v21  ;;  %v2707_v21 = vld [vmem:[%s2693_s28 + $0x8] sm:$0xff] }
  0x27   : > { %2293 = vmatmul.mubr.msk.f32.gmra.mxu1 %vm371_vm1, %v2527_v10 }
  0x28   : > { %935 = vmatprep.mubr.f32.mxu1 %v3109_v0 }
  0x2b   : > { %2294 = vmatmul.mubr.msk.f32.gmra.mxu1 %vm371_vm1, %v2548_v13 }
  0x2c   : > { %941 = vmatprep.mubr.f32.mxu1 %v3109_v0 }
  0x2f   : > { %2295 = vmatmul.mubr.msk.f32.gmra.mxu1 %vm371_vm1, %v358_v15 }
  0x30   : > { %1022 = vmatprep.mubr.f32.mxu1 %v3109_v0 }
  0x33   : > { %2298 = vmatmul.mubr.msk.f32.vlgmr.msra.gmra.mxu1 %vm371_vm1, %v2490_v2 }
  0x34   : > { %1028 = vmatprep.mubr.f32.mxu1 %v3109_v0  ;;  %2303 = vmatpush1.msk.msra.mxu1 %vm384_vm0, %v1051_v25 }
  0x35   : > { %2365 = vmatprep.subr.msk.mxu1 %vm384_vm0, %v2595_v26 }
  0x37   : > { %2299 = vmatmul.mubr.msk.f32.gmra.mxu1 %vm371_vm1, %v2532_v11 }
  0x38   : > { %1034 = vmatprep.mubr.f32.mxu1 %v3109_v0 }
  0x3b   : > { %2300 = vmatmul.mubr.msk.f32.gmra.mxu1 %vm371_vm1, %v2553_v14 }
  0x3c   : > { %1040 = vmatprep.mubr.f32.mxu1 %v3109_v0 }
  0x3f   : > { %2301 = vmatmul.mubr.msk.f32.gmra.mxu1 %vm371_vm1, %v2568_v16 }
  0x40   : > { %1123 = vmatprep.mubr.f32.mxu1 %v3109_v0 }
  0x43   : > { %2304 = vmatmul.mubr.msk.f32.vlgmr.msra.gmra.mxu1 %vm371_vm1, %v2490_v2 }
  0x44   : > { %1129 = vmatprep.mubr.f32.mxu1 %v3109_v0  ;;  %2366 = vmatpush1.msk.msra.mxu1 %vm384_vm0, %v2618_v30 }
  0x45   : > { %2328 = vmatprep.subr.msk.mxu1 %vm384_vm0, %v1496_v31 }
  0x47   : > { %2305 = vmatmul.mubr.msk.f32.gmra.mxu1 %vm371_vm1, %v2532_v11 }
  0x48   : > { %1135 = vmatprep.mubr.f32.mxu1 %v3109_v0 }
  0x4b   : > { %2306 = vmatmul.mubr.msk.f32.gmra.mxu1 %vm371_vm1, %v2553_v14 }
  0x4c   : > { %1141 = vmatprep.mubr.f32.mxu1 %v3109_v0 }
  0x4f   : > { %2307 = vmatmul.mubr.msk.f32.gmra.mxu1 %vm371_vm1, %v2568_v16 }
  0x50   : > { %1474 = vmatprep.mubr.f32.mxu1 %v3109_v0 }
  0x53   : > { %2325 = vmatmul.mubr.msk.f32.vlgmr.msra.gmra.mxu1 %vm371_vm1, %v2527_v10 }
  0x54   : > { %1480 = vmatprep.mubr.f32.mxu1 %v3109_v0  ;;  %2329 = vmatpush1.msk.msra.mxu1 %vm384_vm0, %v1495_v34 }
  0x57   : > { %2326 = vmatmul.mubr.msk.f32.gmra.mxu1 %vm371_vm1, %v2548_v13 }
  0x58   : > { %1486 = vmatprep.mubr.f32.mxu1 %v3109_v0 }
  0x5b   : > { %2327 = vmatmul.mubr.msk.f32.gmra.mxu1 %vm371_vm1, %v358_v15 }
  0x5c   : > { %1567 = vmatprep.mubr.f32.mxu1 %v3109_v0 }
  0x5f   : > { %2330 = vmatmul.mubr.msk.f32.vlgmr.msra.gmra.mxu1 %vm371_vm1, %v2490_v2 }
  0x60   : > { %1573 = vmatprep.mubr.f32.mxu1 %v3109_v0 }
  0x63   : > { %2331 = vmatmul.mubr.msk.f32.gmra.mxu1 %vm371_vm1, %v2532_v11 }
  0x64   : > { %1579 = vmatprep.mubr.f32.mxu1 %v3109_v0 }
  0x67   : > { %2332 = vmatmul.mubr.msk.f32.gmra.mxu1 %vm371_vm1, %v2553_v14 }
  0x68   : > { %1585 = vmatprep.mubr.f32.mxu1 %v3109_v0 }
  0x6b   : > { %2333 = vmatmul.mubr.msk.f32.gmra.mxu1 %vm371_vm1, %v2568_v16 }
  0x6c   : > { %1779 = vmatprep.mubr.f32.mxu1 %v3109_v0 }
  0xd3   : > { %v457_v35 = vpop.f32.mrf.mxu0  ;;  %v558_v36 = vpop.f32.mrf.mxu1 }
  0xd4   : > { %v581_v63 = vmul.f32 %v558_v36, %v457_v35  ;;  %v2728_v36 = vld [vmem:[%s2693_s28 + $0x18] sm:$0xff] }
  0xd5   : > { %v459_v37 = vpop.f32.mrf.mxu0  ;;  %v560_v38 = vpop.f32.mrf.mxu1 }
  0xd6   : > { %v582_v61 = vmul.f32 %v560_v38, %v459_v37  ;;  %v597_v15 = vmul.f32 0.16666667, %v581_v63  ;;  %v2715_v25 = vmul.f32 0.5, %v581_v63  ;;  %v2770_v63 = vld [vmem:[%s2693_s28 + $0x38] sm:$0xff] }
  0xd7   : > { %v463_v39 = vpop.f32.mrf.mxu0  ;;  %v564_v40 = vpop.f32.mrf.mxu1 }
  0xd8   : > { %v2678_v58 = vmul.f32 %v564_v40, %v463_v39  ;;  %v598_v13 = vmul.f32 0.16666667, %v582_v61  ;;  %v2718_v31 = vmul.f32 0.5, %v582_v61 }
  0xd9   : > { %v465_v41 = vpop.f32.mrf.mxu0  ;;  %v566_v42 = vpop.f32.mrf.mxu1 }
  0xda   : > { %v2674_v56 = vmul.f32 %v566_v42, %v465_v41  ;;  %v599_v10 = vmul.f32 0.16666667, %v2678_v58  ;;  %v2743_v42 = vld [vmem:[%s2693_s28 + $0x20] sm:$0xff] }
  0xdb   : > { %v469_v43 = vpop.f32.mrf.mxu0  ;;  %v570_v44 = vpop.f32.mrf.mxu1 }
  0xdc   : > { %v2670_v54 = vmul.f32 %v570_v44, %v469_v43  ;;  %v600_v9 = vmul.f32 0.16666667, %v2674_v56 }
  0xdd   : > { %v471_v45 = vpop.f32.mrf.mxu0  ;;  %v572_v46 = vpop.f32.mrf.mxu1 }
  0xde   : > { %v2666_v52 = vmul.f32 %v572_v46, %v471_v45  ;;  %v601_v5 = vmul.f32 0.16666667, %v2670_v54 }
  0xdf   : > { %v475_v47 = vpop.f32.mrf.mxu0  ;;  %v576_v48 = vpop.f32.mrf.mxu1 }
  0xe0   : > { %v2664_v49 = vmul.f32 %v576_v48, %v475_v47  ;;  %v602_v62 = vmul.f32 0.16666667, %v2666_v52  ;;  %v2754_v47 = vld [vmem:[%s2693_s28 + $0x28] sm:$0xff] }
  0xe1   : > { %v477_v50 = vpop.f32.mrf.mxu0  ;;  %v578_v51 = vpop.f32.mrf.mxu1 }
  0xe2   : > { %v2668_v53 = vmul.f32 %v578_v51, %v477_v50  ;;  %v603_v59 = vmul.f32 0.16666667, %v2664_v49 }
  0xe3   : > { %v2672_v55 = vpop.f32.mrf.mxu1 }
  0xe4   : > { %v604_v57 = vmul.f32 0.16666667, %v2668_v53 }
  0xe5   : > { %v2681_v60 = vpop.f32.mrf.mxu1 }
  0xe6   : > { %2276 = vmatprep.subr.msk.mxu0 %vm636_vm2, %v604_v57 }
  0xe7   : > { %2277 = vmatpush1.msk.msra.mxu0 %vm636_vm2, %v603_v59  ;;  %v2687_v7 = vpop.f32.mrf.mxu1  ;;  %v2764_v59 = vld [vmem:[%s2693_s28 + $0x30] sm:$0xff] }
  0xe8   : > { %669 = vmatprep.subr.mxu0 %v602_v62 }
  0xe9   : > { %670 = vmatpush1.msra.mxu0 %v601_v5  ;;  %v2696_v12 = vpop.f32.mrf.mxu1 }
  0xea   : > { %671 = vmatprep.subr.mxu0 %v600_v9 }
  0xeb   : > { %672 = vmatpush1.msra.mxu0 %v599_v10  ;;  %v2698_v17 = vpop.f32.mrf.mxu1  ;;  %v2776_v10 = vld [vmem:[%s2693_s28 + $0x40] sm:$0xff] }
  0xec   : > { %673 = vmatprep.subr.mxu0 %v598_v13 }
  0xed   : > { %674 = vmatpush1.msra.mxu0 %v597_v15  ;;  %v939_v19 = vpop.f32.mrf.mxu1 }
  0xee   : > { %2278 = vmatmul.mubr.msk.f32.vlgmr.msra.gmra.mxu0 %vm605_vm3, %v2701_v18 }
  0xef   : > { %v943_v20 = vpop.f32.mrf.mxu1  ;;  %713 = vmatprep.mubr.f32.mxu0 %v3109_v0 }
  0xf1   : > { %v945_v22 = vpop.f32.mrf.mxu1 }
  0xf2   : > { %2279 = vmatmul.mubr.msk.f32.gmra.mxu0 %vm605_vm3, %v2707_v21 }
  0xf3   : > { %v1024_v23 = vpop.f32.mrf.mxu1  ;;  %719 = vmatprep.mubr.f32.mxu0 %v3109_v0 }
  0xf4   : > { %v1375_v27 = vmul.f32 %v1024_v23, %v2672_v55  ;;  %v2782_v23 = vld [vmem:[%s2693_s28 + $0x48] sm:$0xff] }
  0xf5   : > { %v1026_v29 = vpop.f32.mrf.mxu1 }
  0xf6   : > { %v2721_v33 = vadd.f32 %v1375_v27, %v2715_v25  ;;  %v1376_v34 = vmul.f32 %v1026_v29, %v2681_v60  ;;  %2280 = vmatmul.mubr.msk.f32.gmra.mxu0 %vm605_vm3, %v2713_v24 }
  0xf7   : > { %v1030_v35 = vpop.f32.mrf.mxu1  ;;  %725 = vmatprep.mubr.f32.mxu0 %v3109_v0 }
  0xf8   : > { %v2731_v37 = vadd.f32 %v1376_v34, %v2718_v31  ;;  %v2734_v38 = vmul.f32 %v1030_v35, %v2687_v7  ;;  %v2785_v34 = vmul.f32 0.5, %v2668_v53 }
  0xf9   : > { %v1032_v39 = vpop.f32.mrf.mxu1 }
  0xfa   : > { %v2737_v40 = vmul.f32 %v1032_v39, %v2696_v12  ;;  %2281 = vmatmul.mubr.msk.f32.gmra.mxu0 %vm605_vm3, %v2728_v36 }
  0xfb   : > { %v1036_v41 = vpop.f32.mrf.mxu1  ;;  %731 = vmatprep.mubr.f32.mxu0 %v3109_v0 }
  0xfc   : > { %v2746_v43 = vmul.f32 %v1036_v41, %v2698_v17  ;;  %v2790_v41 = vmul.f32 0.5, %v2664_v49 }
  0xfd   : > { %v1038_v44 = vpop.f32.mrf.mxu1 }
  0xfe   : > { %v2748_v45 = vmul.f32 %v1038_v44, %v939_v19  ;;  %2282 = vmatmul.mubr.msk.f32.gmra.mxu0 %vm605_vm3, %v2743_v42 }
  0xff   : > { %v1042_v46 = vpop.f32.mrf.mxu1  ;;  %737 = vmatprep.mubr.f32.mxu0 %v3109_v0 }
 0x100   : > { %v2756_v48 = vmul.f32 %v1042_v46, %v943_v20 }
 0x101   : > { %v1044_v50 = vpop.f32.mrf.mxu1 }
 0x102   : > { %v2758_v51 = vmul.f32 %v1044_v50, %v945_v22  ;;  %2283 = vmatmul.mubr.msk.f32.gmra.mxu0 %vm605_vm3, %v2754_v47 }
 0x103   : > { %v1125_v57 = vpop.f32.mrf.mxu1  ;;  %743 = vmatprep.mubr.f32.mxu0 %v3109_v0 }
 0x105   : > { %v1127_v61 = vpop.f32.mrf.mxu1 }
 0x106   : > { %2284 = vmatmul.mubr.msk.f32.gmra.mxu0 %vm605_vm3, %v2764_v59 }
 0x107   : > { %v1131_v62 = vpop.f32.mrf.mxu1  ;;  %749 = vmatprep.mubr.f32.mxu0 %v3109_v0 }
 0x108   : > { %v1150_v50 = vmul.f32 %v1131_v62, %v2687_v7 }
 0x109   : > { %v1133_v5 = vpop.f32.mrf.mxu1 }
 0x10a   : > { %2285 = vmatmul.mubr.msk.f32.gmra.mxu0 %vm605_vm3, %v2770_v63  ;;  %v1151_v53 = vmul.f32 %v1133_v5, %v2696_v12  ;;  %v2815_v12 = vmul.f32 0.5, %v2678_v58 }
 0x10b   : > { %v1137_v9 = vpop.f32.mrf.mxu1  ;;  %755 = vmatprep.mubr.f32.mxu0 %v3109_v0 }
 0x10c   : > { %v1152_v44 = vmul.f32 %v1137_v9, %v2698_v17  ;;  %v2809_v17 = vmul.f32 0.5, %v2674_v56  ;;  %v1149_v9 = vmul.f32 %v1127_v61, %v2681_v60  ;;  %v1593_v60 = vmul.f32 0.5, %v2612_v28 }
 0x10d   : > { %v1139_v13 = vpop.f32.mrf.mxu1  ;;  %v1595_v61 = vmul.f32 0.16666667, %v2595_v26  ;;  %v1158_v5 = vadd.f32 %v1150_v50, %v2815_v12 }
 0x10e   : > { %2286 = vmatmul.mubr.msk.f32.gmra.mxu0 %vm605_vm3, %v2776_v10  ;;  %v1153_v35 = vmul.f32 %v1139_v13, %v939_v19  ;;  %v1159_v56 = vadd.f32 %v1151_v53, %v2809_v17 }
 0x10f   : > { %v1143_v15 = vpop.f32.mrf.mxu1  ;;  %761 = vmatprep.mubr.f32.mxu0 %v3109_v0 }
 0x110   : > { %v1154_v27 = vmul.f32 %v1143_v15, %v943_v20  ;;  %v2797_v20 = vmul.f32 0.5, %v2666_v52 }
 0x111   : > { %v1145_v29 = vpop.f32.mrf.mxu1 }
 0x112   : > { %v1155_v39 = vmul.f32 %v1145_v29, %v945_v22  ;;  %2287 = vmatmul.mubr.msk.f32.gmra.mxu0 %vm605_vm3, %v2782_v23  ;;  %v2802_v22 = vmul.f32 0.5, %v2670_v54  ;;  %v1162_v49 = vadd.f32 %v1154_v27, %v2790_v41  ;;  %v1161_v52 = vadd.f32 %v1153_v35, %v2797_v20 }
 0x113   : > { %v2793_v46 = vpop.f32.mrf.mxu1  ;;  %1234 = vmatprep.mubr.f32.mxu0 %v3109_v0  ;;  %v1148_v54 = vmul.f32 %v1125_v57, %v2672_v55  ;;  %v1157_v55 = vadd.f32 %v1149_v9, %v2718_v31  ;;  %v1597_v27 = vadd.f32 %v1595_v61, %v1593_v60  ;;  %v1594_v9 = vmul.f32 0.16666667, %v2618_v30 }
 0x114   : > { %v1163_v19 = vadd.f32 %v1155_v39, %v2785_v34  ;;  %v1160_v7 = vadd.f32 %v1152_v44, %v2802_v22 }
 0x115   : > { %v2806_v13 = vpop.f32.mrf.mxu1  ;;  %v1156_v57 = vadd.f32 %v1148_v54, %v2715_v25 }
 0x116   : > { %2308 = vmatprep.subr.msk.mxu0 %vm636_vm2, %v1163_v19 }
 0x117   : > { %2309 = vmatpush1.msk.msra.mxu0 %vm636_vm2, %v1162_v49  ;;  %v2820_v62 = vpop.f32.mrf.mxu1  ;;  %v1592_v49 = vmul.f32 0.5, %v2636_v32 }
 0x118   : > { %1196 = vmatprep.subr.mxu0 %v1161_v52 }
 0x119   : > { %1197 = vmatpush1.msra.mxu0 %v1160_v7  ;;  %v2826_v58 = vpop.f32.mrf.mxu1  ;;  %v1596_v54 = vadd.f32 %v1594_v9, %v1592_v49  ;;  %v2878_v7 = vadd.f32 %v2758_v51, %v2785_v34  ;;  %v2894_v51 = vadd.f32 %v2748_v45, %v2797_v20  ;;  %v2913_v45 = vadd.f32 %v2734_v38, %v2815_v12 }
 0x11a   : > { %1198 = vmatprep.subr.mxu0 %v1159_v56 }
 0x11b   : > { %1199 = vmatpush1.msra.mxu0 %v1158_v5  ;;  %v2830_v15 = vpop.f32.mrf.mxu1  ;;  %v2887_v5 = vadd.f32 %v2756_v48, %v2790_v41 }
 0x11c   : > { %1200 = vmatprep.subr.mxu0 %v1157_v55 }
 0x11d   : > { %1201 = vmatpush1.msra.mxu0 %v1156_v57  ;;  %v2836_v29 = vpop.f32.mrf.mxu1  ;;  %v2906_v57 = vadd.f32 %v2737_v40, %v2809_v17 }
 0x11e   : > { %2310 = vmatmul.mubr.msk.f32.vlgmr.msra.gmra.mxu0 %vm605_vm3, %v2701_v18  ;;  %2322 = vmatprep.subr.msk.mxu0 %vm384_vm0, %v2595_v26 }
 0x11f   : > { %1240 = vmatprep.mubr.f32.mxu0 %v3109_v0  ;;  %2323 = vmatpush1.msk.msra.mxu0 %vm384_vm0, %v2618_v30  ;;  %v2844_v25 = vpop.f32.mrf.mxu1 }
 0x120   : > { %2334 = vmatprep.subr.msk.mxu0 %vm384_vm0, %v1597_v27 }
 0x121   : > { %v2849_v31 = vpop.f32.mrf.mxu1 }
 0x122   : > { %2311 = vmatmul.mubr.msk.f32.gmra.mxu0 %vm605_vm3, %v2707_v21 }
 0x123   : > { %1246 = vmatprep.mubr.f32.mxu0 %v3109_v0  ;;  %v1575_v35 = vpop.f32.mrf.mxu1 }
 0x124   : > { %v1922_v48 = vmul.f32 %v1575_v35, %v2793_v46 }
 0x125   : > { %v1577_v39 = vpop.f32.mrf.mxu1 }
 0x126   : > { %2312 = vmatmul.mubr.msk.f32.gmra.mxu0 %vm605_vm3, %v2713_v24  ;;  %v1923_v34 = vmul.f32 %v1577_v39, %v2806_v13  ;;  %v1930_v40 = vadd.f32 %v1922_v48, %v2913_v45 }
 0x127   : > { %1252 = vmatprep.mubr.f32.mxu0 %v3109_v0  ;;  %v1581_v44 = vpop.f32.mrf.mxu1 }
 0x128   : > { %v1924_v55 = vmul.f32 %v1581_v44, %v2820_v62  ;;  %v1931_v20 = vadd.f32 %v1923_v34, %v2906_v57 }
 0x129   : > { %v1583_v53 = vpop.f32.mrf.mxu1 }
 0x12a   : > { %2313 = vmatmul.mubr.msk.f32.gmra.mxu0 %vm605_vm3, %v2728_v36  ;;  %v1925_v60 = vmul.f32 %v1583_v53, %v2826_v58 }
 0x12b   : > { %1258 = vmatprep.mubr.f32.mxu0 %v3109_v0  ;;  %v1587_v19 = vpop.f32.mrf.mxu1 }
 0x12c   : > { %v1926_v56 = vmul.f32 %v1587_v19, %v2830_v15  ;;  %v1933_v27 = vadd.f32 %v1925_v60, %v2894_v51 }
 0x12d   : > { %v1589_v50 = vpop.f32.mrf.mxu1 }
 0x12e   : > { %2314 = vmatmul.mubr.msk.f32.gmra.mxu0 %vm605_vm3, %v2743_v42  ;;  %v1927_v52 = vmul.f32 %v1589_v50, %v2836_v29  ;;  %v1934_v41 = vadd.f32 %v1926_v56, %v2887_v5 }
 0x12f   : > { %1264 = vmatprep.mubr.f32.mxu0 %v3109_v0 }
 0x130   : > { %v1935_v61 = vadd.f32 %v1927_v52, %v2878_v7 }
 0x132   : > { %2315 = vmatmul.mubr.msk.f32.gmra.mxu0 %vm605_vm3, %v2754_v47 }
 0x133   : > { %1270 = vmatprep.mubr.f32.mxu0 %v3109_v0 }
 0x136   : > { %2316 = vmatmul.mubr.msk.f32.gmra.mxu0 %vm605_vm3, %v2764_v59 }
 0x137   : > { %1276 = vmatprep.mubr.f32.mxu0 %v3109_v0 }
 0x13a   : > { %2317 = vmatmul.mubr.msk.f32.gmra.mxu0 %vm605_vm3, %v2770_v63 }
 0x13b   : > { %1282 = vmatprep.mubr.f32.mxu0 %v3109_v0 }
 0x13e   : > { %2318 = vmatmul.mubr.msk.f32.gmra.mxu0 %vm605_vm3, %v2776_v10 }
 0x13f   : > { %1288 = vmatprep.mubr.f32.mxu0 %v3109_v0 }
 0x142   : > { %2319 = vmatmul.mubr.msk.f32.gmra.mxu0 %vm605_vm3, %v2782_v23 }
 0x143   : > { %1468 = vmatprep.mubr.f32.mxu0 %v3109_v0 }
 0x146   : > { %2324 = vmatmul.mubr.msk.f32.vlgmr.msra.gmra.mxu0 %vm371_vm1, %v2485_v1  ;;  %v2900_v1 = vadd.f32 %v2746_v43, %v2802_v22 }
 0x147   : > { %2335 = vmatpush1.msk.msra.mxu0 %vm384_vm0, %v1596_v54  ;;  %1668 = vmatprep.mubr.f32.mxu0 %v3109_v0 }
 0x148   : > { %2352 = vmatprep.subr.msk.mxu0 %vm636_vm2, %v1935_v61  ;;  %v1932_v43 = vadd.f32 %v1924_v55, %v2900_v1 }
 0x14a   : > { %2336 = vmatmul.mubr.msk.f32.vlgmr.msra.gmra.mxu0 %vm371_vm1, %v2490_v2  ;;  %v768_v2 = vlaneseq }
 0x14b   : > { %2353 = vmatpush1.msk.msra.mxu0 %vm636_vm2, %v1934_v41  ;;  %1674 = vmatprep.mubr.f32.mxu0 %v3109_v0 }
 0x14c   : > { %1980 = vmatprep.subr.mxu0 %v1933_v27  ;;  %v769_v38 = vshrl.u32 %v768_v2, 7 }
 0x14d   : > { %1981 = vmatpush1.msra.mxu0 %v1932_v43 }
 0x14e   : > { %1982 = vmatprep.subr.mxu0 %v1931_v20  ;;  %2337 = vmatmul.mubr.msk.f32.gmra.mxu0 %vm371_vm1, %v2532_v11  ;;  %v2929_v22 = vsub.s32 0, %v769_v38  ;;  %v2931_v12 = vsub.s32 1, %v769_v38  ;;  %v2941_v9 = vsub.s32 2, %v769_v38 }
 0x14f   : > { %1983 = vmatpush1.msra.mxu0 %v1930_v40  ;;  %1680 = vmatprep.mubr.f32.mxu0 %v3109_v0 }
 0x150   : > { %v771_v35 = vrot.slane %v2496_v4, %v2929_v22  ;;  %v791_v19 = vrot.slane %v2493_v3, %v2931_v12  ;;  %v803_v41 = vrot.slane %v2496_v4, %v2941_v9  ;;  %v807_v2 = vrot.slane %v2493_v3, %v2941_v9 }
 0x152   : > { %2338 = vmatmul.mubr.msk.f32.gmra.mxu0 %vm371_vm1, %v2553_v14  ;;  %v787_v14 = vrot.slane %v2496_v4, %v2931_v12 }
 0x153   : > { %1686 = vmatprep.mubr.f32.mxu0 %v3109_v0 }
 0x156   : > { %2339 = vmatmul.mubr.msk.f32.gmra.mxu0 %vm371_vm1, %v2568_v16  ;;  %v775_v16 = vrot.slane %v2493_v3, %v2929_v22 }
 0x157   : > { %2018 = vmatprep.mubr.f32.mxu0 %v3109_v0 }
 0x1ae   : > { %v709_v17 = vpop.f32.mrf.mxu0 }
 0x1af   : > { %v776_v53 = vmul.f32 %v771_v35, %v709_v17 }
 0x1b0   : > { %v711_v11 = vpop.f32.mrf.mxu0 }
 0x1b1   : > { %v777_v54 = vmul.f32 %v775_v16, %v711_v11  ;;  %v2947_v11 = vsub.s32 3, %v769_v38 }
 0x1b2   : > { %v715_v39 = vpop.f32.mrf.mxu0 }
 0x1b3   : > { %v778_v56 = vmul.f32 %v771_v35, %v715_v39 }
 0x1b4   : > { %v717_v44 = vpop.f32.mrf.mxu0 }
 0x1b5   : > { %v779_v43 = vmul.f32 %v775_v16, %v717_v44 }
 0x1b6   : > { %v721_v50 = vpop.f32.mrf.mxu0 }
 0x1b7   : > { %v792_v49 = vmul.f32 %v787_v14, %v721_v50 }
 0x1b8   : > { %v723_v52 = vpop.f32.mrf.mxu0 }
 0x1b9   : > { %v796_v60 = vadd.f32 %v792_v49, %v776_v53  ;;  %v793_v61 = vmul.f32 %v791_v19, %v723_v52 }
 0x1ba   : > { %v727_v55 = vpop.f32.mrf.mxu0 }
 0x1bb   : > { %v797_v34 = vadd.f32 %v793_v61, %v777_v54  ;;  %v794_v48 = vmul.f32 %v787_v14, %v727_v55  ;;  %v819_v54 = vrot.slane %v2496_v4, %v2947_v11 }
 0x1bc   : > { %v729_v27 = vpop.f32.mrf.mxu0 }
 0x1bd   : > { %v798_v20 = vadd.f32 %v794_v48, %v778_v56  ;;  %v795_v40 = vmul.f32 %v791_v19, %v729_v27  ;;  %v823_v56 = vrot.slane %v2493_v3, %v2947_v11  ;;  %v2953_v27 = vsub.s32 4, %v769_v38 }
 0x1be   : > { %v733_v17 = vpop.f32.mrf.mxu0 }
 0x1bf   : > { %v799_v50 = vadd.f32 %v795_v40, %v779_v43  ;;  %v808_v0 = vmul.f32 %v803_v41, %v733_v17  ;;  %v835_v17 = vrot.slane %v2496_v4, %v2953_v27  ;;  %v1298_v4 = vrot.slane %v2515_v8, %v2929_v22 }
 0x1c0   : > { %v735_v35 = vpop.f32.mrf.mxu0 }
 0x1c1   : > { %v812_v39 = vadd.f32 %v808_v0, %v796_v60  ;;  %v809_v53 = vmul.f32 %v807_v2, %v735_v35 }
 0x1c2   : > { %v739_v49 = vpop.f32.mrf.mxu0 }
 0x1c3   : > { %v813_v14 = vadd.f32 %v809_v53, %v797_v34  ;;  %v810_v52 = vmul.f32 %v803_v41, %v739_v49  ;;  %v839_v53 = vrot.slane %v2493_v3, %v2953_v27 }
 0x1c4   : > { %v741_v44 = vpop.f32.mrf.mxu0 }
 0x1c5   : > { %v814_v16 = vadd.f32 %v810_v52, %v798_v20  ;;  %v811_v19 = vmul.f32 %v807_v2, %v741_v44 }
 0x1c6   : > { %v745_v61 = vpop.f32.mrf.mxu0 }
 0x1c7   : > { %v815_v55 = vadd.f32 %v811_v19, %v799_v50  ;;  %v824_v48 = vmul.f32 %v819_v54, %v745_v61 }
 0x1c8   : > { %v747_v43 = vpop.f32.mrf.mxu0 }
 0x1c9   : > { %v828_v0 = vadd.f32 %v824_v48, %v812_v39  ;;  %v825_v60 = vmul.f32 %v823_v56, %v747_v43 }
 0x1ca   : > { %v751_v40 = vpop.f32.mrf.mxu0 }
 0x1cb   : > { %v829_v34 = vadd.f32 %v825_v60, %v813_v14  ;;  %v826_v41 = vmul.f32 %v819_v54, %v751_v40 }
 0x1cc   : > { %v753_v35 = vpop.f32.mrf.mxu0 }
 0x1cd   : > { %v830_v20 = vadd.f32 %v826_v41, %v814_v16  ;;  %v827_v2 = vmul.f32 %v823_v56, %v753_v35  ;;  %v1302_v16 = vrot.slane %v2504_v6, %v2929_v22 }
 0x1ce   : > { %v757_v49 = vpop.f32.mrf.mxu0 }
 0x1cf   : > { %v831_v50 = vadd.f32 %v827_v2, %v815_v55  ;;  %v840_v52 = vmul.f32 %v835_v17, %v757_v49  ;;  %v1318_v49 = vrot.slane %v2504_v6, %v2931_v12 }
 0x1d0   : > { %v759_v38 = vpop.f32.mrf.mxu0 }
 0x1d1   : > { %v844_v44 = vadd.f32 %v840_v52, %v828_v0  ;;  %v841_v19 = vmul.f32 %v839_v53, %v759_v38 }
 0x1d2   : > { %v763_v39 = vpop.f32.mrf.mxu0 }
 0x1d3   : > { %v845_v61 = vadd.f32 %v841_v19, %v829_v34  ;;  %v842_v48 = vmul.f32 %v835_v17, %v763_v39  ;;  %v1314_v34 = vrot.slane %v2515_v8, %v2931_v12 }
 0x1d4   : > { %v765_v14 = vpop.f32.mrf.mxu0 }
 0x1d5   : > { %v846_v54 = vadd.f32 %v842_v48, %v830_v20  ;;  %v843_v43 = vmul.f32 %v839_v53, %v765_v14 }
 0x1d7   : > { %v847_v60 = vadd.f32 %v843_v43, %v831_v50 }
 0x1de   : > { %v1236_v3 = vpop.f32.mrf.mxu0 }
 0x1df   : > { %v1303_v56 = vmul.f32 %v1298_v4, %v1236_v3 }
 0x1e0   : > { %v1238_v55 = vpop.f32.mrf.mxu0 }
 0x1e1   : > { %v1307_v40 = vadd.f32 %v1303_v56, %v844_v44  ;;  %v1304_v41 = vmul.f32 %v1302_v16, %v1238_v55 }
 0x1e2   : > { %v1242_v0 = vpop.f32.mrf.mxu0 }
 0x1e3   : > { %v1308_v35 = vadd.f32 %v1304_v41, %v845_v61  ;;  %v1305_v2 = vmul.f32 %v1298_v4, %v1242_v0  ;;  %v1330_v61 = vrot.slane %v2515_v8, %v2941_v9 }
 0x1e4   : > { %v1244_v17 = vpop.f32.mrf.mxu0 }
 0x1e5   : > { %v1309_v20 = vadd.f32 %v1305_v2, %v846_v54  ;;  %v1306_v53 = vmul.f32 %v1302_v16, %v1244_v17  ;;  %v1334_v54 = vrot.slane %v2504_v6, %v2941_v9 }
 0x1e6   : > { %v1248_v50 = vpop.f32.mrf.mxu0 }
 0x1e7   : > { %v1310_v52 = vadd.f32 %v1306_v53, %v847_v60  ;;  %v1319_v38 = vmul.f32 %v1314_v34, %v1248_v50 }
 0x1e8   : > { %v1250_v19 = vpop.f32.mrf.mxu0 }
 0x1e9   : > { %v1323_v39 = vadd.f32 %v1319_v38, %v1307_v40  ;;  %v1320_v48 = vmul.f32 %v1318_v49, %v1250_v19 }
 0x1ea   : > { %v1254_v44 = vpop.f32.mrf.mxu0 }
 0x1eb   : > { %v1324_v14 = vadd.f32 %v1320_v48, %v1308_v35  ;;  %v1321_v43 = vmul.f32 %v1314_v34, %v1254_v44  ;;  %v1346_v35 = vrot.slane %v2515_v8, %v2947_v11 }
 0x1ec   : > { %v1256_v4 = vpop.f32.mrf.mxu0 }
 0x1ed   : > { %v1325_v3 = vadd.f32 %v1321_v43, %v1309_v20  ;;  %v1322_v56 = vmul.f32 %v1318_v49, %v1256_v4  ;;  %v1350_v20 = vrot.slane %v2504_v6, %v2947_v11 }
 0x1ee   : > { %v1260_v16 = vpop.f32.mrf.mxu0 }
 0x1ef   : > { %v1326_v55 = vadd.f32 %v1322_v56, %v1310_v52  ;;  %v1335_v41 = vmul.f32 %v1330_v61, %v1260_v16 }
 0x1f0   : > { %v1262_v60 = vpop.f32.mrf.mxu0 }
 0x1f1   : > { %v1339_v0 = vadd.f32 %v1335_v41, %v1323_v39  ;;  %v1336_v2 = vmul.f32 %v1334_v54, %v1262_v60 }
 0x1f2   : > { %v1266_v40 = vpop.f32.mrf.mxu0 }
 0x1f3   : > { %v1340_v17 = vadd.f32 %v1336_v2, %v1324_v14  ;;  %v1337_v53 = vmul.f32 %v1330_v61, %v1266_v40  ;;  %v1362_v14 = vrot.slane %v2515_v8, %v2953_v27 }
 0x1f4   : > { %v1268_v34 = vpop.f32.mrf.mxu0 }
 0x1f5   : > { %v1341_v50 = vadd.f32 %v1337_v53, %v1325_v3  ;;  %v1338_v38 = vmul.f32 %v1334_v54, %v1268_v34  ;;  %v1366_v54 = vrot.slane %v2504_v6, %v2953_v27 }
 0x1f6   : > { %v1272_v49 = vpop.f32.mrf.mxu0 }
 0x1f7   : > { %v1342_v19 = vadd.f32 %v1338_v38, %v1326_v55  ;;  %v1351_v48 = vmul.f32 %v1346_v35, %v1272_v49 }
 0x1f8   : > { %v1274_v52 = vpop.f32.mrf.mxu0 }
 0x1f9   : > { %v1355_v44 = vadd.f32 %v1351_v48, %v1339_v0  ;;  %v1352_v43 = vmul.f32 %v1350_v20, %v1274_v52 }
 0x1fa   : > { %v1278_v39 = vpop.f32.mrf.mxu0 }
 0x1fb   : > { %v1356_v4 = vadd.f32 %v1352_v43, %v1340_v17  ;;  %v1353_v56 = vmul.f32 %v1346_v35, %v1278_v39 }
 0x1fc   : > { %v1280_v61 = vpop.f32.mrf.mxu0 }
 0x1fd   : > { %v1357_v16 = vadd.f32 %v1353_v56, %v1341_v50  ;;  %v1354_v3 = vmul.f32 %v1350_v20, %v1280_v61  ;;  %v1941_v61 = vld [vmem:[%s335_s8 + $0x8] sm:$0xff] }
 0x1fe   : > { %v1284_v41 = vpop.f32.mrf.mxu0 }
 0x1ff   : > { %v1358_v60 = vadd.f32 %v1354_v3, %v1342_v19  ;;  %v1367_v55 = vmul.f32 %v1362_v14, %v1284_v41 }
 0x200   : > { %v1286_v2 = vpop.f32.mrf.mxu0 }
 0x201   : > { %v2979_v40 = vadd.f32 %v1367_v55, %v1355_v44  ;;  %v1368_v0 = vmul.f32 %v1366_v54, %v1286_v2  ;;  %v1937_v44 = vadd.f32 %v2595_v26, %v2612_v28 }
 0x202   : > { %v1290_v53 = vpop.f32.mrf.mxu0 }
 0x203   : > { %v2981_v17 = vadd.f32 %v1368_v0, %v1356_v4  ;;  %v1369_v35 = vmul.f32 %v1362_v14, %v1290_v53  ;;  %v1940_v4 = vld [vmem:[%s335_s8] sm:$0xff]  ;;  %v3111_v14 = vmov 0.0  }
 0x204   : > { %v1292_v34 = vpop.f32.mrf.mxu0 }
 0x205   : > { %v2983_v8 = vadd.f32 %v1369_v35, %v1357_v16  ;;  %v1370_v50 = vmul.f32 %v1366_v54, %v1292_v34  ;;  %v1938_v16 = vld [vmem:[%s330_s11] sm:$0xff] }
 0x206   : > { %v1470_v38 = vpop.f32.mrf.mxu0 }
 0x207   : > { %v2986_v20 = vadd.f32 %v1370_v50, %v1358_v60  ;;  %v1920_v6 = vmul.f32 %v2844_v25, %v1470_v38  ;;  %v1936_v25 = vadd.f32 %v2618_v30, %v2636_v32  ;;  %v1939_v60 = vld [vmem:[%s330_s11 + $0x8] sm:$0xff] }
 0x208   : > { %v1472_v49 = vpop.f32.mrf.mxu0 }
 0x209   : > { %v1921_v19 = vmul.f32 %v2849_v31, %v1472_v49  ;;  %v1928_v43 = vadd.f32 %v1920_v6, %v2721_v33 }
 0x20a   : > { %v1670_v48 = vpop.f32.mrf.mxu0 }
 0x20b   : > { %v1929_v52 = vadd.f32 %v1921_v19, %v2731_v37 }
 0x20c   : > { %v1672_v39 = vpop.f32.mrf.mxu0 }
 0x20d   : > { %1984 = vmatprep.subr.mxu0 %v1929_v52  ;;  %v1694_v50 = vmul.f32 %v1672_v39, %v1472_v49  ;;  %v1875_v52 = vrot.slane %v2618_v30, %v2941_v9 }
 0x20e   : > { %v1676_v56 = vpop.f32.mrf.mxu0  ;;  %1985 = vmatpush1.msra.mxu0 %v1928_v43 }
 0x20f   : > { %2354 = vmatmul.mubr.msk.f32.vlgmr.msra.gmra.mxu0 %vm605_vm3, %v1940_v4  ;;  %2356 = vmatprep.subr.msk.mxu0 %vm384_vm0, %v1937_v44  ;;  %v1695_v34 = vmul.f32 %v1676_v56, %v2793_v46  ;;  %v1702_v46 = vadd.f32 %v1694_v50, %v2731_v37  ;;  %v1879_v4 = vrot.slane %v2595_v26, %v2941_v9 }
 0x210   : > { %v1678_v31 = vpop.f32.mrf.mxu0  ;;  %2024 = vmatprep.mubr.f32.mxu0 %v3111_v14  ;;  %2357 = vmatpush1.msk.msra.mxu0 %vm384_vm0, %v1936_v25  ;;  %v1911_v50 = vrot.slane %v2595_v26, %v2953_v27 }
 0x211   : > { %v1696_v53 = vmul.f32 %v1678_v31, %v2806_v13 }
 0x212   : > { %v1682_v28 = vpop.f32.mrf.mxu0 }
 0x213   : > { %2355 = vmatmul.mubr.msk.f32.gmra.mxu0 %vm605_vm3, %v1941_v61  ;;  %v1697_v0 = vmul.f32 %v1682_v28, %v2820_v62  ;;  %v1704_v13 = vadd.f32 %v1696_v53, %v2906_v57  ;;  %v1703_v62 = vadd.f32 %v1695_v34, %v2913_v45  ;;  %v1859_v45 = vrot.slane %v2618_v30, %v2931_v12 }
 0x214   : > { %v1684_v32 = vpop.f32.mrf.mxu0  ;;  %2107 = vmatprep.mubr.f32.mxu0 %v3111_v14 }
 0x215   : > { %v1698_v55 = vmul.f32 %v1684_v32, %v2826_v58  ;;  %v1693_v58 = vmul.f32 %v1670_v48, %v1470_v38  ;;  %v1863_v48 = vrot.slane %v2595_v26, %v2931_v12  ;;  %v1895_v12 = vrot.slane %v2595_v26, %v2947_v11 }
 0x216   : > { %v1688_v3 = vpop.f32.mrf.mxu0 }
 0x217   : > { %2358 = vmatmul.mubr.msk.f32.vlgmr.msra.gmra.mxu0 %vm371_vm1, %v1938_v16  ;;  %v1699_v54 = vmul.f32 %v1688_v3, %v2830_v15  ;;  %v1706_v6 = vadd.f32 %v1698_v55, %v2894_v51 }
 0x218   : > { %v1690_v41 = vpop.f32.mrf.mxu0  ;;  %2113 = vmatprep.mubr.f32.mxu0 %v3111_v14 }
 0x219   : > { %v1700_v2 = vmul.f32 %v1690_v41, %v2836_v29  ;;  %v1707_v15 = vadd.f32 %v1699_v54, %v2887_v5  ;;  %v1705_v29 = vadd.f32 %v1697_v0, %v2900_v1  ;;  %v1907_v54 = vrot.slane %v2618_v30, %v2953_v27 }
 0x21b   : > { %v1708_v35 = vadd.f32 %v1700_v2, %v2878_v7  ;;  %2359 = vmatmul.mubr.msk.f32.gmra.mxu0 %vm371_vm1, %v1939_v60  ;;  %v1701_v7 = vadd.f32 %v1693_v58, %v2721_v33 }
 0x21d   : > { %2340 = vmatprep.subr.msk.mxu1 %vm636_vm2, %v1708_v35 }
 0x21e   : > { %2341 = vmatpush1.msk.msra.mxu1 %vm636_vm2, %v1707_v15 }
 0x21f   : > { %1741 = vmatprep.subr.mxu1 %v1706_v6 }
 0x220   : > { %1742 = vmatpush1.msra.mxu1 %v1705_v29 }
 0x221   : > { %1743 = vmatprep.subr.mxu1 %v1704_v13 }
 0x222   : > { %1744 = vmatpush1.msra.mxu1 %v1703_v62 }
 0x223   : > { %1745 = vmatprep.subr.mxu1 %v1702_v46 }
 0x224   : > { %1746 = vmatpush1.msra.mxu1 %v1701_v7 }
 0x225   : > { %2342 = vmatmul.mubr.msk.f32.vlgmr.msra.gmra.mxu1 %vm605_vm3, %v2701_v18 }
 0x226   : > { %1785 = vmatprep.mubr.f32.mxu1 %v3111_v14 }
 0x229   : > { %2343 = vmatmul.mubr.msk.f32.gmra.mxu1 %vm605_vm3, %v2707_v21 }
 0x22a   : > { %1791 = vmatprep.mubr.f32.mxu1 %v3111_v14 }
 0x22d   : > { %2344 = vmatmul.mubr.msk.f32.gmra.mxu1 %vm605_vm3, %v2713_v24 }
 0x22e   : > { %1797 = vmatprep.mubr.f32.mxu1 %v3111_v14 }
 0x231   : > { %2345 = vmatmul.mubr.msk.f32.gmra.mxu1 %vm605_vm3, %v2728_v36 }
 0x232   : > { %1803 = vmatprep.mubr.f32.mxu1 %v3111_v14 }
 0x235   : > { %2346 = vmatmul.mubr.msk.f32.gmra.mxu1 %vm605_vm3, %v2743_v42 }
 0x236   : > { %1809 = vmatprep.mubr.f32.mxu1 %v3111_v14 }
 0x239   : > { %2347 = vmatmul.mubr.msk.f32.gmra.mxu1 %vm605_vm3, %v2754_v47 }
 0x23a   : > { %1815 = vmatprep.mubr.f32.mxu1 %v3111_v14 }
 0x23d   : > { %2348 = vmatmul.mubr.msk.f32.gmra.mxu1 %vm605_vm3, %v2764_v59 }
 0x23e   : > { %1821 = vmatprep.mubr.f32.mxu1 %v3111_v14 }
 0x241   : > { %2349 = vmatmul.mubr.msk.f32.gmra.mxu1 %vm605_vm3, %v2770_v63 }
 0x242   : > { %1827 = vmatprep.mubr.f32.mxu1 %v3111_v14 }
 0x245   : > { %2350 = vmatmul.mubr.msk.f32.gmra.mxu1 %vm605_vm3, %v2776_v10  ;;  %v1843_v10 = vrot.slane %v2618_v30, %v2929_v22 }
 0x246   : > { %1833 = vmatprep.mubr.f32.mxu1 %v3111_v14 }
 0x249   : > { %2351 = vmatmul.mubr.msk.f32.gmra.mxu1 %vm605_vm3, %v2782_v23  ;;  %v1847_v23 = vrot.slane %v2595_v26, %v2929_v22  ;;  %v1891_v22 = vrot.slane %v2618_v30, %v2947_v11 }
 0x2cf   : > { %v2020_v42 = vpop.f32.mrf.mxu0 }
 0x2d1   : > { %v3056_v63 = vpop.f32.mrf.mxu0 }
 0x2d3   : > { %v3058_v1 = vpop.f32.mrf.mxu0 }
 0x2d5   : > { %v3066_v49 = vpop.f32.mrf.mxu0 }
 0x2d7   : > { %v2109_v31 = vpop.f32.mrf.mxu0 }
 0x2d9   : > { %v2111_v35 = vpop.f32.mrf.mxu0 }
 0x2e5   : > { %v1781_v18 = vpop.f32.mrf.mxu1 }
 0x2e6   : > { %v1848_v19 = vmul.f32 %v1843_v10, %v1781_v18 }
 0x2e7   : > { %v1783_v21 = vpop.f32.mrf.mxu1 }
 0x2e8   : > { %v1849_v43 = vmul.f32 %v1847_v23, %v1783_v21  ;;  %v1852_v14 = vadd.f32 %v1848_v19, %v2979_v40  ;;  %v2110_v21 = vadd.f32 %v2109_v31, %v2020_v42 }
 0x2e9   : > { %v1787_v24 = vpop.f32.mrf.mxu1 }
 0x2ea   : > { %v1850_v25 = vmul.f32 %v1843_v10, %v1787_v24  ;;  %v1853_v9 = vadd.f32 %v1849_v43, %v2981_v17  ;;  %v2115_v24 = vpop.f32.mrf.mxu0 }
 0x2eb   : > { %v1789_v33 = vpop.f32.mrf.mxu1  ;;  %v2116_v42 = vadd.f32 %v2115_v24, %v3058_v1 }
 0x2ec   : > { %v1851_v32 = vmul.f32 %v1847_v23, %v1789_v33  ;;  %v1854_v2 = vadd.f32 %v1850_v25, %v2983_v8  ;;  %v2117_v23 = vpop.f32.mrf.mxu0 }
 0x2ed   : > { %v1793_v36 = vpop.f32.mrf.mxu1  ;;  %v2118_v43 = vadd.f32 %v2117_v23, %v3066_v49 }
 0x2ee   : > { %v1864_v39 = vmul.f32 %v1859_v45, %v1793_v36  ;;  %v1855_v30 = vadd.f32 %v1851_v32, %v2986_v20  ;;  %v2112_v20 = vadd.f32 %v2111_v35, %v3056_v63 }
 0x2ef   : > { %v1795_v37 = vpop.f32.mrf.mxu1 }
 0x2f0   : > { %v1865_v61 = vmul.f32 %v1863_v48, %v1795_v37  ;;  %v1868_v41 = vadd.f32 %v1864_v39, %v1852_v14 }
 0x2f1   : > { %v1799_v47 = vpop.f32.mrf.mxu1 }
 0x2f2   : > { %v1866_v16 = vmul.f32 %v1859_v45, %v1799_v47  ;;  %v1869_v34 = vadd.f32 %v1865_v61, %v1853_v9 }
 0x2f3   : > { %v1801_v59 = vpop.f32.mrf.mxu1 }
 0x2f4   : > { %v1867_v0 = vmul.f32 %v1863_v48, %v1801_v59  ;;  %v1870_v6 = vadd.f32 %v1866_v16, %v1854_v2 }
 0x2f5   : > { %v1805_v5 = vpop.f32.mrf.mxu1 }
 0x2f6   : > { %v1880_v28 = vmul.f32 %v1875_v52, %v1805_v5  ;;  %v1871_v46 = vadd.f32 %v1867_v0, %v1855_v30 }
 0x2f7   : > { %v1807_v51 = vpop.f32.mrf.mxu1 }
 0x2f8   : > { %v1881_v60 = vmul.f32 %v1879_v4, %v1807_v51  ;;  %v1884_v11 = vadd.f32 %v1880_v28, %v1868_v41 }
 0x2f9   : > { %v1811_v57 = vpop.f32.mrf.mxu1 }
 0x2fa   : > { %v1882_v40 = vmul.f32 %v1875_v52, %v1811_v57  ;;  %v1885_v29 = vadd.f32 %v1881_v60, %v1869_v34 }
 0x2fb   : > { %v1813_v38 = vpop.f32.mrf.mxu1 }
 0x2fc   : > { %v1883_v17 = vmul.f32 %v1879_v4, %v1813_v38  ;;  %v1886_v7 = vadd.f32 %v1882_v40, %v1870_v6 }
 0x2fd   : > { %v1817_v44 = vpop.f32.mrf.mxu1 }
 0x2fe   : > { %v1896_v55 = vmul.f32 %v1891_v22, %v1817_v44  ;;  %v1887_v26 = vadd.f32 %v1883_v17, %v1871_v46 }
 0x2ff   : > { %v1819_v56 = vpop.f32.mrf.mxu1 }
 0x300   : > { %v1897_v15 = vmul.f32 %v1895_v12, %v1819_v56  ;;  %v1900_v13 = vadd.f32 %v1896_v55, %v1884_v11 }
 0x301   : > { %v1823_v3 = vpop.f32.mrf.mxu1 }
 0x302   : > { %v1898_v62 = vmul.f32 %v1891_v22, %v1823_v3  ;;  %v1901_v33 = vadd.f32 %v1897_v15, %v1885_v29 }
 0x303   : > { %v1825_v53 = vpop.f32.mrf.mxu1 }
 0x304   : > { %v1899_v36 = vmul.f32 %v1895_v12, %v1825_v53  ;;  %v1902_v59 = vadd.f32 %v1898_v62, %v1886_v7 }
 0x305   : > { %v1829_v58 = vpop.f32.mrf.mxu1 }
 0x306   : > { %v1912_v8 = vmul.f32 %v1907_v54, %v1829_v58  ;;  %v1903_v45 = vadd.f32 %v1899_v36, %v1887_v26 }
 0x307   : > { %v1831_v18 = vpop.f32.mrf.mxu1 }
 0x308   : > { %v1916_v37 = vadd.f32 %v1912_v8, %v1900_v13  ;;  %v1913_v47 = vmul.f32 %v1911_v50, %v1831_v18 }
 0x309   : > { %v1835_v27 = vpop.f32.mrf.mxu1 }
 0x30a   : > { %v1917_v5 = vadd.f32 %v1913_v47, %v1901_v33  ;;  %v2120_v51 = vadd.f32 %v2110_v21, %v1916_v37  ;;  %v1914_v10 = vmul.f32 %v1907_v54, %v1835_v27 }
 0x30b   : > { %v1837_v57 = vpop.f32.mrf.mxu1 }
 0x30c   : > { %2124 = vst [vmem:[%s349_s15] sm:$0xff] %v2120_v51  ;;  %v1918_v38 = vadd.f32 %v1914_v10, %v1902_v59  ;;  %v2121_v19 = vadd.f32 %v2112_v20, %v1917_v5  ;;  %v1915_v48 = vmul.f32 %v1911_v50, %v1837_v57 }
 0x30e   : > { %2125 = vst [vmem:[%s349_s15 + $0x8] sm:$0xff] %v2121_v19  ;;  %v1919_v52 = vadd.f32 %v1915_v48, %v1903_v45  ;;  %v2122_v44 = vadd.f32 %v2116_v42, %v1918_v38 }
 0x310   : > { %2126 = vst [vmem:[%s349_s15 + $0x10] sm:$0xff] %v2122_v44  ;;  %v2123_v63 = vadd.f32 %v2118_v43, %v1919_v52 }
 0x312   : > { %2127 = vst [vmem:[%s349_s15 + $0x18] sm:$0xff] %v2123_v63 }
 0x313 PF: > { %s16_s23 = sadd.s32 1, %s2416_s23   ;;  %s3112_s21 = smov %s2412_s22 }
 0x314   : > { %p13_p5 = scmp.ge.s32.totalorder %s16_s23, 4   ;;  %s3113_s22 = smov %s3115_s24 }
 0x316   :  { %15 = sbr.rel (!%p13_p5) target bundleno = 2 (0x2), region = 85 }

</bundles_post_ra>
